<compile_context>
chip_gen: v7x
topology: tpu7x:2x2x1
jax: 0.10.0
libtpu: 0.0.40
codegen_flags: <defaults>
</compile_context>

<pallas_src>
import functools

import jax
import jax.numpy as jnp
from jax import lax
from jax.experimental import pallas as pl
from jax.experimental.pallas import tpu as pltpu


# ----------------------------------------------------------------------------
# Counter-based keep-mask (shared by kernels and the host-side verification).
# ----------------------------------------------------------------------------
def _u32_hash(x):
    """Murmur3-style finalizer on uint32 values (pure jnp, lowers everywhere)."""
    x = x ^ (x >> 16)
    x = x * jnp.uint32(0x85EBCA6B)
    x = x ^ (x >> 13)
    x = x * jnp.uint32(0xC2B2AE35)
    x = x ^ (x >> 16)
    return x


def _keep_mask_from_index(idx_i32, seed_i32, rate):
    """keep[i] = (hash(idx ^ f(seed)) >= rate * 2^32)  --  P(keep) = 1 - rate."""
    mixed = idx_i32 ^ (seed_i32 * jnp.int32(7919) + jnp.int32(104729))
    bits = _u32_hash(mixed.astype(jnp.uint32))
    threshold = jnp.uint32(min(int(float(rate) * 4294967296.0), 4294967295))
    return bits >= threshold


def _host_keep_mask(shape, seed, rate):
    """Pure-JAX replica of the in-kernel mask (verification only)."""
    rows, cols = shape
    idx = (jnp.arange(rows, dtype=jnp.int32)[:, None] * jnp.int32(cols)
           + jnp.arange(cols, dtype=jnp.int32)[None, :])
    return _keep_mask_from_index(idx, jnp.int32(seed), rate)


def _dropped_weight_host(w_t, seed, rate):
    """Host replica of the in-kernel in-place DropConnect on a (rows, cols) weight."""
    if rate <= 0.0:
        return w_t
    keep = _host_keep_mask(w_t.shape, seed, rate)
    scale = jnp.float32(1.0 / (1.0 - rate))
    return jnp.where(keep, w_t.astype(jnp.float32) * scale, 0.0).astype(w_t.dtype)


def _reorder_gate_blocks(w, H, axis=0):
    """PyTorch LSTM gate order [i, f, g, o] -> kernel order [i, f, o, g].

    A bijective re-indexing of the weight, so the i.i.d. Bernoulli DropConnect
    mask drawn over the reordered layout is distributionally identical to one
    drawn over the PyTorch layout."""
    blocks = [lax.slice_in_dim(w, k * H, (k + 1) * H, axis=axis) for k in range(4)]
    return jnp.concatenate([blocks[0], blocks[1], blocks[3], blocks[2]], axis=axis)


# ----------------------------------------------------------------------------
# Kernel 1: standalone tiled weight dropout (weights not fused into the LSTM).
# ----------------------------------------------------------------------------
def _weight_dropout_kernel(seed_ref, w_ref, out_ref, *, rate, block_rows, total_cols):
    r0 = pl.program_id(0) * block_rows
    rows_blk, cols_blk = w_ref.shape
    rows = r0 + lax.broadcasted_iota(jnp.int32, (rows_blk, cols_blk), 0)
    cols = lax.broadcasted_iota(jnp.int32, (rows_blk, cols_blk), 1)
    keep = _keep_mask_from_index(rows * jnp.int32(total_cols) + cols,
                                 seed_ref[0], rate)
    scale = jnp.float32(1.0 / (1.0 - rate))
    out_ref[...] = jnp.where(
        keep, w_ref[...].astype(jnp.float32) * scale, 0.0).astype(out_ref.dtype)


def apply_weight_dropout(raw_w, seed, rate, *, block_rows=512):
    """F.dropout(raw_w, rate, training=True), tiled over rows on-chip.

    Purely HBM-bound; ~512-row tiles keep it near the HBM roofline while the
    2-in + 2-out pipeline buffers stay under the scoped-VMEM budget."""
    rate = float(rate)
    if rate <= 0.0:
        return raw_w
    if rate >= 1.0:
        raise ValueError(f"dropout rate must be in [0, 1), got {rate}")

    orig_shape = raw_w.shape
    w2 = raw_w.reshape(orig_shape[0], -1) if raw_w.ndim >= 2 else raw_w.reshape(1, -1)
    rows, cols = w2.shape
    dsize = w2.dtype.itemsize

    if rows <= block_rows:
        br = rows                                   # single full block
    else:
        br = block_rows
        while br > 8 and 4 * br * cols * dsize > (12 << 20):   # 2 in + 2 out bufs
            br //= 2
        br = max(8, (br // 8) * 8)
    vmem_limit = int(min(100 << 20, max(8 * br * cols * dsize + (2 << 20), 16 << 20)))

    out = pl.pallas_call(
        functools.partial(_weight_dropout_kernel, rate=rate,
                          block_rows=br, total_cols=cols),
        out_shape=jax.ShapeDtypeStruct((rows, cols), raw_w.dtype),
        grid_spec=pltpu.PrefetchScalarGridSpec(
            num_scalar_prefetch=1,
            grid=(pl.cdiv(rows, br),),
            in_specs=[pl.BlockSpec((br, cols), lambda i, s: (i, 0))],
            out_specs=pl.BlockSpec((br, cols), lambda i, s: (i, 0)),
        ),
        compiler_params=pltpu.CompilerParams(
            dimension_semantics=("parallel",),
            vmem_limit_bytes=vmem_limit),
    )(jnp.asarray(seed, dtype=jnp.int32).reshape((1,)), w2)
    return out.reshape(orig_shape)


# ----------------------------------------------------------------------------
# Kernel 2: fused (weight-dropout + single-layer LSTM) forward.
# ----------------------------------------------------------------------------
def _mask_weight_inplace(w_ref, seed, rate):
    """DropConnect applied in place to a resident VMEM weight (bf16 storage)."""
    rows_n, cols_n = w_ref.shape
    rows = lax.broadcasted_iota(jnp.int32, (rows_n, cols_n), 0)
    cols = lax.broadcasted_iota(jnp.int32, (rows_n, cols_n), 1)
    keep = _keep_mask_from_index(rows * jnp.int32(cols_n) + cols, seed, rate)
    scale = jnp.float32(1.0 / (1.0 - rate))
    w_ref[...] = jnp.where(keep, w_ref[...].astype(jnp.float32) * scale,
                           0.0).astype(w_ref.dtype)


def _wdrop_lstm_kernel(seed_ref, x_ref, wih_hbm, whh_hbm, b_ref,
                       y_ref, hn_ref, cn_ref,
                       wih_sc, whh_sc, gx_sc, h_sc, c_sc, dma_sem,
                       *, hidden_size, time_block, batch_block,
                       rate_ih, rate_hh, unroll):
    t_idx = pl.program_id(1)                      # time-block index (arbitrary)
    H = hidden_size
    H3 = 3 * H
    Bt = batch_block

    # First time step of each batch tile: DMA weights once into VMEM (single
    # residency), apply the DropConnect mask in place, reset the h/c carries.
    @pl.when(t_idx == 0)
    def _init():
        cp_ih = pltpu.make_async_copy(wih_hbm, wih_sc, dma_sem.at[0])
        cp_hh = pltpu.make_async_copy(whh_hbm, whh_sc, dma_sem.at[1])
        cp_ih.start()
        cp_hh.start()
        h_sc[...] = jnp.zeros_like(h_sc)
        c_sc[...] = jnp.zeros_like(c_sc)
        cp_ih.wait()
        cp_hh.wait()
        if rate_ih > 0.0:
            _mask_weight_inplace(wih_sc, seed_ref[0], rate_ih)
        if rate_hh > 0.0:
            _mask_weight_inplace(whh_sc, seed_ref[1], rate_hh)

    # Non-recurrent input projection for the whole time block: ONE MXU matmul
    # (bf16 x bf16 -> f32), staged to VMEM so it never lives in vregs.
    in_sz = x_ref.shape[-1]
    x_blk = x_ref[...].reshape(time_block * Bt, in_sz)           # bf16
    gx_sc[...] = (jnp.dot(x_blk, wih_sc[...],
                          preferred_element_type=jnp.float32)
                  + b_ref[...])                                  # (TB*Bt, 4H) f32

    # Recurrence: small (Bt, H) @ (H, 4H) matmul per step; gates reordered so
    # one sigmoid covers [i, f, o] and one tanh covers [g].
    def step(t, carry):
        h, c = carry
        row0 = pl.multiple_of(t * Bt, Bt)
        gates = gx_sc[pl.ds(row0, Bt), :] + jnp.dot(
            h.astype(whh_sc.dtype), whh_sc[...],
            preferred_element_type=jnp.float32)                  # (Bt, 4H) f32
        sig = jax.nn.sigmoid(gates[:, :H3])
        g_g = jnp.tanh(gates[:, H3:])
        c = sig[:, H:2 * H] * c + sig[:, :H] * g_g
        h = sig[:, 2 * H:H3] * jnp.tanh(c)
        y_ref[t] = h.astype(y_ref.dtype)
        return h, c

    h, c = lax.fori_loop(0, time_block, step, (h_sc[...], c_sc[...]),
                         unroll=unroll)
    h_sc[...] = h
    c_sc[...] = c

    @pl.when(t_idx == pl.num_programs(1) - 1)
    def _finalize():
        hn_ref[...] = h.astype(hn_ref.dtype)
        cn_ref[...] = c.astype(cn_ref.dtype)


def lstm_forward(x, w_ih, w_hh, b_ih, b_hh, *, seeds=(0, 0),
                 dropout_ih=0.0, dropout_hh=0.0, training=False,
                 time_block=None, batch_block=None):
    """x: (T, B, I) f32. Returns (y:(T,B,H), (h_n:(1,B,H), c_n:(1,B,H))).

    DropConnect on W_ih / W_hh is fused into the kernel (mask generated
    on-chip at the first time step of every batch tile)."""
    T, B, I = x.shape
    H4, H = w_hh.shape
    assert H4 == 4 * H
    out_dtype = x.dtype

    rate_ih = float(dropout_ih) if training else 0.0
    rate_hh = float(dropout_hh) if training else 0.0
    for r in (rate_ih, rate_hh):
        if not 0.0 <= r < 1.0:
            raise ValueError(f"dropout rate must be in [0, 1), got {r}")

    # Glue: reorder gates [i,f,g,o]->[i,f,o,g], transpose to (K, 4H), bf16 for MXU.
    wih_t = jnp.transpose(_reorder_gate_blocks(w_ih, H)).astype(jnp.bfloat16)
    whh_t = jnp.transpose(_reorder_gate_blocks(w_hh, H)).astype(jnp.bfloat16)
    b = _reorder_gate_blocks(b_ih + b_hh, H).reshape(1, H4).astype(jnp.float32)

    # Batch padding / tiling (leading "parallel" grid axis -> v7x megacore).
    Bp8 = ((B + 7) // 8) * 8
    if batch_block is None:
        Bt = Bp8
    else:
        Bt = min(max(8, ((int(batch_block) + 7) // 8) * 8), Bp8)
    Bp = ((Bp8 + Bt - 1) // Bt) * Bt
    n_bt = Bp // Bt

    # Time blocking: biggest power-of-two block that divides T and keeps the
    # staged input projection within a modest VMEM budget.
    if time_block is None:
        TB = 1
        for cand in (128, 64, 32, 16, 8, 4, 2, 1):
            if T % cand == 0 and cand * Bt * H4 * 4 <= (6 << 20):
                TB = cand
                break
    else:
        TB = int(time_block)
        if T % TB != 0:
            raise ValueError("time_block must divide the sequence length")
    unroll = next(u for u in (8, 4, 2, 1) if TB % u == 0)

    x_p = x if Bp == B else jnp.pad(x, ((0, 0), (0, Bp - B), (0, 0)))
    x_p = x_p.astype(jnp.bfloat16)

    # Explicit scoped-VMEM limit sized to actual residency (+ headroom); the
    # default 16/32 MiB limit binds long before physical VMEM otherwise.
    osize = jnp.dtype(out_dtype).itemsize
    resident = (I * H4 + H * H4) * 2 + TB * Bt * H4 * 4 + 2 * Bt * H * 4
    pipelined = 2 * (TB * Bt * I * 2 + TB * Bt * H * osize
                     + H4 * 4 + 2 * Bt * H * osize)
    vmem_limit = int(min(100 << 20,
                         max(2 * (resident + pipelined) + (4 << 20), 16 << 20)))

    grid_spec = pltpu.PrefetchScalarGridSpec(
        num_scalar_prefetch=1,                                   # seeds -> SMEM
        grid=(n_bt, T // TB),
        in_specs=[
            pl.BlockSpec((TB, Bt, I), lambda bt, g, s: (g, bt, 0)),  # x block
            pl.BlockSpec(memory_space=pl.ANY),   # W_ih^T in HBM; DMA'd once
            pl.BlockSpec(memory_space=pl.ANY),   # W_hh^T in HBM; DMA'd once
            pl.BlockSpec((1, H4), lambda bt, g, s: (0, 0)),          # bias
        ],
        out_specs=[
            pl.BlockSpec((TB, Bt, H), lambda bt, g, s: (g, bt, 0)),  # y block
            pl.BlockSpec((Bt, H), lambda bt, g, s: (bt, 0)),         # h_n
            pl.BlockSpec((Bt, H), lambda bt, g, s: (bt, 0)),         # c_n
        ],
        scratch_shapes=[
            pltpu.VMEM((I, H4), jnp.bfloat16),        # resident dropped W_ih^T
            pltpu.VMEM((H, H4), jnp.bfloat16),        # resident dropped W_hh^T
            pltpu.VMEM((TB * Bt, H4), jnp.float32),   # staged input projection
            pltpu.VMEM((Bt, H), jnp.float32),         # h carry
            pltpu.VMEM((Bt, H), jnp.float32),         # c carry
            pltpu.SemaphoreType.DMA((2,)),
        ],
    )

    y_p, hn_p, cn_p = pl.pallas_call(
        functools.partial(_wdrop_lstm_kernel, hidden_size=H, time_block=TB,
                          batch_block=Bt, rate_ih=rate_ih, rate_hh=rate_hh,
                          unroll=unroll),
        out_shape=(
            jax.ShapeDtypeStruct((T, Bp, H), out_dtype),
            jax.ShapeDtypeStruct((Bp, H), out_dtype),
            jax.ShapeDtypeStruct((Bp, H), out_dtype),
        ),
        grid_spec=grid_spec,
        compiler_params=pltpu.CompilerParams(
            dimension_semantics=("parallel", "arbitrary"),
            vmem_limit_bytes=vmem_limit),
    )(jnp.asarray(seeds, dtype=jnp.int32).reshape((2,)), x_p, wih_t, whh_t, b)

    return y_p[:, :B, :], (hn_p[:B][None], cn_p[:B][None])


# ----------------------------------------------------------------------------
# WeightDrop wrapper (parameter plumbing = glue, compute = Pallas kernels).
# ----------------------------------------------------------------------------
class WeightDrop:
    def __init__(self, lstm_params, weights, dropout_rate=0.0, variational=False,
                 time_block=None, batch_block=None):
        self.params = dict(lstm_params)
        self.weights = list(weights)
        self.dropout_rate = float(dropout_rate)
        # `variational` is stored but unused in the reference forward().
        self.variational = variational
        self.training = True
        self.time_block = time_block
        self.batch_block = batch_block
        # _setup(): stash raw copies of the weights to be dropped.
        self._raw_weights = {w + "_raw": self.params[w] for w in self.weights}

    def __call__(self, x, seed=0):
        rate = self.dropout_rate if self.training else 0.0
        params = dict(self.params)
        drop_ih = drop_hh = 0.0
        seed_ih = seed_hh = 0
        for idx, w_name in enumerate(self.weights):
            raw_w = self._raw_weights[w_name + "_raw"]
            if w_name == "weight_hh_l0":
                params[w_name] = raw_w            # dropout fused into the kernel
                drop_hh, seed_hh = rate, seed + idx
            elif w_name == "weight_ih_l0":
                params[w_name] = raw_w            # dropout fused into the kernel
                drop_ih, seed_ih = rate, seed + idx
            elif rate > 0.0:
                params[w_name] = apply_weight_dropout(raw_w, seed + idx, rate)
            else:
                params[w_name] = raw_w
        return lstm_forward(
            x,
            params["weight_ih_l0"], params["weight_hh_l0"],
            params["bias_ih_l0"], params["bias_hh_l0"],
            seeds=(seed_ih, seed_hh),
            dropout_ih=drop_ih, dropout_hh=drop_hh,
            training=self.training and rate > 0.0,
            time_block=self.time_block,
            batch_block=self.batch_block,
        )


# ----------------------------------------------------------------------------
# Pure-JAX references (for correctness checks only).
# ----------------------------------------------------------------------------
def lstm_replica(x, w_ih, w_hh, b_ih, b_hh, *, seeds=(0, 0),
                 dropout_ih=0.0, dropout_hh=0.0, training=False):
    """Replicates the kernel math exactly (gate reorder, bf16 matmuls, mask)."""
    H4, H = w_hh.shape
    H3 = 3 * H
    wih_t = jnp.transpose(_reorder_gate_blocks(w_ih, H)).astype(jnp.bfloat16)
    whh_t = jnp.transpose(_reorder_gate_blocks(w_hh, H)).astype(jnp.bfloat16)
    b = _reorder_gate_blocks(b_ih + b_hh, H).astype(jnp.float32)
    if training:
        wih_t = _dropped_weight_host(wih_t, seeds[0], float(dropout_ih))
        whh_t = _dropped_weight_host(whh_t, seeds[1], float(dropout_hh))
    xb = x.astype(jnp.bfloat16)
    B = x.shape[1]

    def step(carry, x_t):
        h, c = carry
        gates = (jnp.dot(x_t, wih_t, preferred_element_type=jnp.float32) + b
                 + jnp.dot(h.astype(jnp.bfloat16), whh_t,
                           preferred_element_type=jnp.float32))
        sig = jax.nn.sigmoid(gates[:, :H3])
        g_g = jnp.tanh(gates[:, H3:])
        c = sig[:, H:2 * H] * c + sig[:, :H] * g_g
        h = sig[:, 2 * H:H3] * jnp.tanh(c)
        return (h, c), h

    init = (jnp.zeros((B, H), jnp.float32), jnp.zeros((B, H), jnp.float32))
    (hn, cn), ys = lax.scan(step, init, xb)
    return (ys.astype(x.dtype),
            (hn[None].astype(x.dtype), cn[None].astype(x.dtype)))


def lstm_reference(x, w_ih, w_hh, b_ih, b_hh):
    """Plain f32, PyTorch-layout LSTM (semantic reference, eval mode)."""
    T, B, _ = x.shape
    H = w_hh.shape[1]

    def step(carry, x_t):
        h, c = carry
        gates = x_t @ w_ih.T + b_ih + h @ w_hh.T + b_hh
        i_g = jax.nn.sigmoid(gates[:, 0:H])
        f_g = jax.nn.sigmoid(gates[:, H:2 * H])
        g_g = jnp.tanh(gates[:, 2 * H:3 * H])
        o_g = jax.nn.sigmoid(gates[:, 3 * H:4 * H])
        c_new = f_g * c + i_g * g_g
        h_new = o_g * jnp.tanh(c_new)
        return (h_new, c_new), h_new

    init = (jnp.zeros((B, H), x.dtype), jnp.zeros((B, H), x.dtype))
    (hn, cn), ys = lax.scan(step, init, x)
    return ys, (hn[None], cn[None])


if __name__ == "__main__":
    key = jax.random.PRNGKey(0)
    T, B, I, H = 8, 2, 32, 32     # seq=8, batch=2, input=32, hidden=32

    k_wih, k_whh, k_bih, k_bhh, k_x, k_x2 = jax.random.split(key, 6)
    bound = 1.0 / float(H) ** 0.5
    lstm_params = {
        "weight_ih_l0": jax.random.uniform(k_wih, (4 * H, I), jnp.float32, -bound, bound),
        "weight_hh_l0": jax.random.uniform(k_whh, (4 * H, H), jnp.float32, -bound, bound),
        "bias_ih_l0":   jax.random.uniform(k_bih, (4 * H,), jnp.float32, -bound, bound),
        "bias_hh_l0":   jax.random.uniform(k_bhh, (4 * H,), jnp.float32, -bound, bound),
    }
    x = jax.random.normal(k_x, (T, B, I), jnp.float32)

    # time_block=4 -> 2 time grid steps, exercising the cross-block h/c carry.
    model = WeightDrop(lstm_params, weights=["weight_hh_l0"],
                       dropout_rate=0.5, variational=False, time_block=4)

    # ---- Training mode: DropConnect mask fused into the LSTM kernel ----
    seed = 42
    y_tr, (hn_tr, cn_tr) = model(x, seed=seed)
    jax.block_until_ready((y_tr, hn_tr, cn_tr))
    assert y_tr.shape == (T, B, H)
    assert hn_tr.shape == (1, B, H) and cn_tr.shape == (1, B, H)

    y_rep, (hn_rep, cn_rep) = lstm_replica(
        x, lstm_params["weight_ih_l0"], lstm_params["weight_hh_l0"],
        lstm_params["bias_ih_l0"], lstm_params["bias_hh_l0"],
        seeds=(0, seed), dropout_ih=0.0, dropout_hh=0.5, training=True)
    assert jnp.allclose(y_tr, y_rep, atol=5e-3, rtol=5e-3)
    assert jnp.allclose(hn_tr, hn_rep, atol=5e-3, rtol=5e-3)
    assert jnp.allclose(cn_tr, cn_rep, atol=5e-3, rtol=5e-3)

    # ---- Eval mode: dropout is identity ----
    model.training = False
    y_ev, (hn_ev, cn_ev) = model(x)
    jax.block_until_ready(y_ev)
    y_rep2, (hn_rep2, cn_rep2) = lstm_replica(
        x, lstm_params["weight_ih_l0"], lstm_params["weight_hh_l0"],
        lstm_params["bias_ih_l0"], lstm_params["bias_hh_l0"], training=False)
    assert jnp.allclose(y_ev, y_rep2, atol=5e-3, rtol=5e-3)
    assert jnp.allclose(hn_ev, hn_rep2, atol=5e-3, rtol=5e-3)
    assert jnp.allclose(cn_ev, cn_rep2, atol=5e-3, rtol=5e-3)
    # Semantic check vs the plain f32 PyTorch-layout reference (bf16 MXU path
    # inside the kernel -> looser tolerance).
    y_f32, (hn_f32, cn_f32) = lstm_reference(
        x, lstm_params["weight_ih_l0"], lstm_params["weight_hh_l0"],
        lstm_params["bias_ih_l0"], lstm_params["bias_hh_l0"])
    assert jnp.allclose(y_ev, y_f32, atol=5e-2, rtol=5e-2)
    assert jnp.allclose(hn_ev, hn_f32, atol=5e-2, rtol=5e-2)
    assert jnp.allclose(cn_ev, cn_f32, atol=5e-2, rtol=5e-2)

    # ---- Fused W_ih + W_hh dropout, batch-tiled grid (2 batch tiles) ----
    B2 = 16
    x2 = jax.random.normal(k_x2, (T, B2, I), jnp.float32)
    y2, (hn2, cn2) = lstm_forward(
        x2, lstm_params["weight_ih_l0"], lstm_params["weight_hh_l0"],
        lstm_params["bias_ih_l0"], lstm_params["bias_hh_l0"],
        seeds=(7, 11), dropout_ih=0.3, dropout_hh=0.5, training=True,
        time_block=2, batch_block=8)
    jax.block_until_ready(y2)
    y2r, (hn2r, cn2r) = lstm_replica(
        x2, lstm_params["weight_ih_l0"], lstm_params["weight_hh_l0"],
        lstm_params["bias_ih_l0"], lstm_params["bias_hh_l0"],
        seeds=(7, 11), dropout_ih=0.3, dropout_hh=0.5, training=True)
    assert jnp.allclose(y2, y2r, atol=5e-3, rtol=5e-3)
    assert jnp.allclose(hn2, hn2r, atol=5e-3, rtol=5e-3)
    assert jnp.allclose(cn2, cn2r, atol=5e-3, rtol=5e-3)

    # ---- Standalone tiled dropout kernel (path used for non-fused weights) ----
    w_ih_dropped = apply_weight_dropout(lstm_params["weight_ih_l0"], seed=7, rate=0.5)
    jax.block_until_ready(w_ih_dropped)
    drop_frac = float(jnp.mean((w_ih_dropped == 0.0).astype(jnp.float32)))
    assert 0.35 < drop_frac < 0.65, drop_frac
    kept_err = jnp.abs(jnp.where(w_ih_dropped != 0.0,
                                 w_ih_dropped - 2.0 * lstm_params["weight_ih_l0"],
                                 0.0)).max()
    assert float(kept_err) < 1e-6

    print("KERNEL_OK")
</pallas_src>

<mosaic_0001>
module attributes {stable_mosaic.version = 11 : i64} {
  func.func @_wdrop_lstm_kernel(%arg0: i32, %arg1: i32, %arg2: memref<2xi32, #tpu.memory_space<smem>>, %arg3: memref<4x8x32xbf16, #tpu.memory_space<vmem>>, %arg4: memref<32x128xbf16, #tpu.memory_space<any>>, %arg5: memref<32x128xbf16, #tpu.memory_space<any>>, %arg6: memref<1x128xf32, #tpu.memory_space<vmem>>, %arg7: memref<4x8x32xf32, #tpu.memory_space<vmem>>, %arg8: memref<8x32xf32, #tpu.memory_space<vmem>>, %arg9: memref<8x32xf32, #tpu.memory_space<vmem>>, %arg10: memref<32x128xbf16, #tpu.memory_space<vmem>>, %arg11: memref<32x128xbf16, #tpu.memory_space<vmem>>, %arg12: memref<32x128xf32, #tpu.memory_space<vmem>>, %arg13: memref<8x32xf32, #tpu.memory_space<vmem>>, %arg14: memref<8x32xf32, #tpu.memory_space<vmem>>, %arg15: memref<2x!tpu.dma_semaphore, #tpu.memory_space<semaphore_mem>>) attributes {dimension_semantics = [#tpu.dimension_semantics<parallel>, #tpu.dimension_semantics<arbitrary>], iteration_bounds = array<i64: 1, 2>, scalar_prefetch = 1 : i64, scratch_operands = 6 : i64, tpu.core_type = #tpu.core_type<tc>, window_params = [{transform_indices = @transform_0, window_bounds = array<i64: 4, 8, 32>}, {}, {}, {pipeline_mode = #tpu.pipeline_mode<synchronous>, transform_indices = @transform_3, window_bounds = array<i64: 1, 128>}, {transform_indices = @transform_4, window_bounds = array<i64: 4, 8, 32>}, {transform_indices = @transform_5, window_bounds = array<i64: 8, 32>}, {transform_indices = @transform_6, window_bounds = array<i64: 8, 32>}]} {
    %c0_i32 = arith.constant 0 : i32
    %0 = arith.cmpi eq, %arg1, %c0_i32 : i32
    %1 = arith.extui %0 : i1 to i32
    %c0_i32_0 = arith.constant 0 : i32
    %2 = arith.cmpi ne, %1, %c0_i32_0 : i32
    scf.if %2 {
      %c0_i32_51 = arith.constant 0 : i32
      %130 = tpu.memref_slice %arg15[%c0_i32_51] : memref<2x!tpu.dma_semaphore, #tpu.memory_space<semaphore_mem>> -> memref<1x!tpu.dma_semaphore, #tpu.memory_space<semaphore_mem>>
      %131 = tpu.memref_squeeze %130 : memref<1x!tpu.dma_semaphore, #tpu.memory_space<semaphore_mem>> -> memref<!tpu.dma_semaphore, #tpu.memory_space<semaphore_mem>>
      tpu.enqueue_dma source(%arg4 : memref<32x128xbf16, #tpu.memory_space<any>>) target(%arg10 : memref<32x128xbf16, #tpu.memory_space<vmem>>) target_semaphore(%131 : memref<!tpu.dma_semaphore, #tpu.memory_space<semaphore_mem>>)
      %c1_i32_52 = arith.constant 1 : i32
      %132 = tpu.memref_slice %arg15[%c1_i32_52] : memref<2x!tpu.dma_semaphore, #tpu.memory_space<semaphore_mem>> -> memref<1x!tpu.dma_semaphore, #tpu.memory_space<semaphore_mem>>
      %133 = tpu.memref_squeeze %132 : memref<1x!tpu.dma_semaphore, #tpu.memory_space<semaphore_mem>> -> memref<!tpu.dma_semaphore, #tpu.memory_space<semaphore_mem>>
      tpu.enqueue_dma source(%arg5 : memref<32x128xbf16, #tpu.memory_space<any>>) target(%arg11 : memref<32x128xbf16, #tpu.memory_space<vmem>>) target_semaphore(%133 : memref<!tpu.dma_semaphore, #tpu.memory_space<semaphore_mem>>)
      %cst_53 = arith.constant 0.000000e+00 : f32
      %134 = vector.broadcast %cst_53 : f32 to vector<8x32xf32>
      %c0_54 = arith.constant 0 : index
      %c0_55 = arith.constant 0 : index
      %135 = vector.load %arg13[%c0_54, %c0_55] : memref<8x32xf32, #tpu.memory_space<vmem>>, vector<8x32xf32>
      tpu.vector_store %arg13[%c0_54, %c0_55], %134 {strides = array<i32>} : memref<8x32xf32, #tpu.memory_space<vmem>>, vector<8x32xf32>,
      %cst_56 = arith.constant 0.000000e+00 : f32
      %136 = vector.broadcast %cst_56 : f32 to vector<8x32xf32>
      %c0_57 = arith.constant 0 : index
      %c0_58 = arith.constant 0 : index
      %137 = vector.load %arg14[%c0_57, %c0_58] : memref<8x32xf32, #tpu.memory_space<vmem>>, vector<8x32xf32>
      tpu.vector_store %arg14[%c0_57, %c0_58], %136 {strides = array<i32>} : memref<8x32xf32, #tpu.memory_space<vmem>>, vector<8x32xf32>,
      %c0_i32_59 = arith.constant 0 : i32
      %138 = tpu.memref_slice %arg15[%c0_i32_59] : memref<2x!tpu.dma_semaphore, #tpu.memory_space<semaphore_mem>> -> memref<1x!tpu.dma_semaphore, #tpu.memory_space<semaphore_mem>>
      %139 = tpu.memref_squeeze %138 : memref<1x!tpu.dma_semaphore, #tpu.memory_space<semaphore_mem>> -> memref<!tpu.dma_semaphore, #tpu.memory_space<semaphore_mem>>
      tpu.wait_dma2 semaphore(%139 : memref<!tpu.dma_semaphore, #tpu.memory_space<semaphore_mem>>) src(%arg4 : memref<32x128xbf16, #tpu.memory_space<any>>) dst(%arg10 : memref<32x128xbf16, #tpu.memory_space<vmem>>)
      %c1_i32_60 = arith.constant 1 : i32
      %140 = tpu.memref_slice %arg15[%c1_i32_60] : memref<2x!tpu.dma_semaphore, #tpu.memory_space<semaphore_mem>> -> memref<1x!tpu.dma_semaphore, #tpu.memory_space<semaphore_mem>>
      %141 = tpu.memref_squeeze %140 : memref<1x!tpu.dma_semaphore, #tpu.memory_space<semaphore_mem>> -> memref<!tpu.dma_semaphore, #tpu.memory_space<semaphore_mem>>
      tpu.wait_dma2 semaphore(%141 : memref<!tpu.dma_semaphore, #tpu.memory_space<semaphore_mem>>) src(%arg5 : memref<32x128xbf16, #tpu.memory_space<any>>) dst(%arg11 : memref<32x128xbf16, #tpu.memory_space<vmem>>)
      %c1 = arith.constant 1 : index
      %142 = memref.load %arg2[%c1] : memref<2xi32, #tpu.memory_space<smem>>
      %143 = tpu.iota {dimensions = array<i32: 0>} : vector<32x128xi32>
      %144 = tpu.iota {dimensions = array<i32: 1>} : vector<32x128xi32>
      %c128_i32 = arith.constant 128 : i32
      %145 = vector.broadcast %c128_i32 : i32 to vector<32x128xi32>
      %146 = arith.muli %143, %145 : vector<32x128xi32>
      %147 = arith.addi %146, %144 : vector<32x128xi32>
      %c7919_i32 = arith.constant 7919 : i32
      %148 = arith.muli %142, %c7919_i32 : i32
      %c104729_i32 = arith.constant 104729 : i32
      %149 = arith.addi %148, %c104729_i32 : i32
      %150 = vector.broadcast %149 : i32 to vector<32x128xi32>
      %151 = arith.xori %147, %150 : vector<32x128xi32>
      %c16_i32 = arith.constant 16 : i32
      %152 = vector.broadcast %c16_i32 : i32 to vector<32x128xi32>
      %153 = arith.shrui %151, %152 : vector<32x128xi32>
      %154 = arith.xori %151, %153 : vector<32x128xi32>
      %c-2048144789_i32 = arith.constant -2048144789 : i32
      %155 = vector.broadcast %c-2048144789_i32 : i32 to vector<32x128xi32>
      %156 = arith.muli %154, %155 : vector<32x128xi32>
      %c13_i32 = arith.constant 13 : i32
      %157 = vector.broadcast %c13_i32 : i32 to vector<32x128xi32>
      %158 = arith.shrui %156, %157 : vector<32x128xi32>
      %159 = arith.xori %156, %158 : vector<32x128xi32>
      %c-1028477387_i32 = arith.constant -1028477387 : i32
      %160 = vector.broadcast %c-1028477387_i32 : i32 to vector<32x128xi32>
      %161 = arith.muli %159, %160 : vector<32x128xi32>
      %c16_i32_61 = arith.constant 16 : i32
      %162 = vector.broadcast %c16_i32_61 : i32 to vector<32x128xi32>
      %163 = arith.shrui %161, %162 : vector<32x128xi32>
      %164 = arith.xori %161, %163 : vector<32x128xi32>
      %c-2147483648_i32 = arith.constant -2147483648 : i32
      %165 = vector.broadcast %c-2147483648_i32 : i32 to vector<32x128xi32>
      %166 = arith.cmpi uge, %164, %165 : vector<32x128xi32>
      %c0_62 = arith.constant 0 : index
      %c0_63 = arith.constant 0 : index
      %167 = vector.load %arg11[%c0_62, %c0_63] : memref<32x128xbf16, #tpu.memory_space<vmem>>, vector<32x128xbf16>
      %168 = arith.extf %167 : vector<32x128xbf16> to vector<32x128xf32>
      %cst_64 = arith.constant 2.000000e+00 : f32
      %169 = vector.broadcast %cst_64 : f32 to vector<32x128xf32>
      %170 = arith.mulf %168, %169 : vector<32x128xf32>
      %cst_65 = arith.constant 0.000000e+00 : f32
      %171 = vector.broadcast %cst_65 : f32 to vector<32x128xf32>
      %172 = arith.select %166, %170, %171 : vector<32x128xi1>, vector<32x128xf32>
      %173 = arith.truncf %172 : vector<32x128xf32> to vector<32x128xbf16>
      %c0_66 = arith.constant 0 : index
      %c0_67 = arith.constant 0 : index
      %174 = vector.load %arg11[%c0_66, %c0_67] : memref<32x128xbf16, #tpu.memory_space<vmem>>, vector<32x128xbf16>
      tpu.vector_store %arg11[%c0_66, %c0_67], %173 {strides = array<i32>} : memref<32x128xbf16, #tpu.memory_space<vmem>>, vector<32x128xbf16>,
    } else {
    }
    %c0 = arith.constant 0 : index
    %c0_1 = arith.constant 0 : index
    %c0_2 = arith.constant 0 : index
    %3 = vector.load %arg3[%c0, %c0_1, %c0_2] : memref<4x8x32xbf16, #tpu.memory_space<vmem>>, vector<4x8x32xbf16>
    %4 = vector.shape_cast %3 : vector<4x8x32xbf16> to vector<32x32xbf16>
    %c0_3 = arith.constant 0 : index
    %c0_4 = arith.constant 0 : index
    %5 = vector.load %arg10[%c0_3, %c0_4] : memref<32x128xbf16, #tpu.memory_space<vmem>>, vector<32x128xbf16>
    %cst = arith.constant dense<0.000000e+00> : vector<32x128xf32>
    %6 = tpu.matmul %4, %5, %cst {dimension_numbers = #tpu.dot_dimension_numbers<[1], [0], [0], [1], [0, 0, 1, 1], [], []>} : vector<32x32xbf16>, vector<32x128xbf16>, vector<32x128xf32> -> vector<32x128xf32>
    %c0_5 = arith.constant 0 : index
    %c0_6 = arith.constant 0 : index
    %7 = vector.load %arg6[%c0_5, %c0_6] : memref<1x128xf32, #tpu.memory_space<vmem>>, vector<1x128xf32>
    %8 = vector.broadcast %7 : vector<1x128xf32> to vector<32x128xf32>
    %9 = arith.addf %6, %8 : vector<32x128xf32>
    %c0_7 = arith.constant 0 : index
    %c0_8 = arith.constant 0 : index
    %10 = vector.load %arg12[%c0_7, %c0_8] : memref<32x128xf32, #tpu.memory_space<vmem>>, vector<32x128xf32>
    tpu.vector_store %arg12[%c0_7, %c0_8], %9 {strides = array<i32>} : memref<32x128xf32, #tpu.memory_space<vmem>>, vector<32x128xf32>,
    %c0_9 = arith.constant 0 : index
    %c0_10 = arith.constant 0 : index
    %11 = vector.load %arg13[%c0_9, %c0_10] : memref<8x32xf32, #tpu.memory_space<vmem>>, vector<8x32xf32>
    %c0_11 = arith.constant 0 : index
    %c0_12 = arith.constant 0 : index
    %12 = vector.load %arg14[%c0_11, %c0_12] : memref<8x32xf32, #tpu.memory_space<vmem>>, vector<8x32xf32>
    %c0_i32_13 = arith.constant 0 : i32
    %c8_i32 = arith.constant 8 : i32
    %13 = arith.muli %c0_i32_13, %c8_i32 : i32
    %14 = tpu.assume_multiple %13, 8 : i32
    %15 = arith.index_cast %14 : i32 to index
    %c0_14 = arith.constant 0 : index
    %16 = vector.load %arg12[%15, %c0_14] : memref<32x128xf32, #tpu.memory_space<vmem>>, vector<8x128xf32>
    %17 = arith.truncf %11 : vector<8x32xf32> to vector<8x32xbf16>
    %c0_15 = arith.constant 0 : index
    %c0_16 = arith.constant 0 : index
    %18 = vector.load %arg11[%c0_15, %c0_16] : memref<32x128xbf16, #tpu.memory_space<vmem>>, vector<32x128xbf16>
    %cst_17 = arith.constant dense<0.000000e+00> : vector<8x128xf32>
    %19 = tpu.matmul %17, %18, %cst_17 {dimension_numbers = #tpu.dot_dimension_numbers<[1], [0], [0], [1], [0, 0, 1, 1], [], []>} : vector<8x32xbf16>, vector<32x128xbf16>, vector<8x128xf32> -> vector<8x128xf32>
    %20 = arith.addf %16, %19 : vector<8x128xf32>
    %21 = vector.extract_strided_slice %20 {offsets = [0, 0], sizes = [8, 96], strides = [1, 1]} : vector<8x128xf32> to vector<8x96xf32>
    %22 = arith.negf %21 : vector<8x96xf32>
    %23 = math.exp %22 : vector<8x96xf32>
    %cst_18 = arith.constant 1.000000e+00 : f32
    %24 = vector.broadcast %cst_18 : f32 to vector<8x96xf32>
    %25 = arith.addf %24, %23 : vector<8x96xf32>
    %26 = arith.divf %24, %25 : vector<8x96xf32>
    %27 = vector.extract_strided_slice %20 {offsets = [0, 96], sizes = [8, 32], strides = [1, 1]} : vector<8x128xf32> to vector<8x32xf32>
    %28 = math.tanh %27 : vector<8x32xf32>
    %29 = vector.extract_strided_slice %26 {offsets = [0, 32], sizes = [8, 32], strides = [1, 1]} : vector<8x96xf32> to vector<8x32xf32>
    %30 = arith.mulf %29, %12 : vector<8x32xf32>
    %31 = vector.extract_strided_slice %26 {offsets = [0, 0], sizes = [8, 32], strides = [1, 1]} : vector<8x96xf32> to vector<8x32xf32>
    %32 = arith.mulf %31, %28 : vector<8x32xf32>
    %33 = arith.addf %30, %32 : vector<8x32xf32>
    %34 = vector.extract_strided_slice %26 {offsets = [0, 64], sizes = [8, 32], strides = [1, 1]} : vector<8x96xf32> to vector<8x32xf32>
    %35 = math.tanh %33 : vector<8x32xf32>
    %36 = arith.mulf %34, %35 : vector<8x32xf32>
    %37 = arith.index_cast %c0_i32_13 : i32 to index
    %c0_19 = arith.constant 0 : index
    %c0_20 = arith.constant 0 : index
    %38 = vector.load %arg7[%37, %c0_19, %c0_20] : memref<4x8x32xf32, #tpu.memory_space<vmem>>, vector<1x8x32xf32>
    %39 = vector.shape_cast %38 : vector<1x8x32xf32> to vector<8x32xf32>
    %40 = vector.shape_cast %36 : vector<8x32xf32> to vector<1x8x32xf32>
    tpu.vector_store %arg7[%37, %c0_19, %c0_20], %40 {strides = array<i32>} : memref<4x8x32xf32, #tpu.memory_space<vmem>>, vector<1x8x32xf32>,
    %c1_i32 = arith.constant 1 : i32
    %c8_i32_21 = arith.constant 8 : i32
    %41 = arith.muli %c1_i32, %c8_i32_21 : i32
    %42 = tpu.assume_multiple %41, 8 : i32
    %43 = arith.index_cast %42 : i32 to index
    %c0_22 = arith.constant 0 : index
    %44 = vector.load %arg12[%43, %c0_22] : memref<32x128xf32, #tpu.memory_space<vmem>>, vector<8x128xf32>
    %45 = arith.truncf %36 : vector<8x32xf32> to vector<8x32xbf16>
    %c0_23 = arith.constant 0 : index
    %c0_24 = arith.constant 0 : index
    %46 = vector.load %arg11[%c0_23, %c0_24] : memref<32x128xbf16, #tpu.memory_space<vmem>>, vector<32x128xbf16>
    %cst_25 = arith.constant dense<0.000000e+00> : vector<8x128xf32>
    %47 = tpu.matmul %45, %46, %cst_25 {dimension_numbers = #tpu.dot_dimension_numbers<[1], [0], [0], [1], [0, 0, 1, 1], [], []>} : vector<8x32xbf16>, vector<32x128xbf16>, vector<8x128xf32> -> vector<8x128xf32>
    %48 = arith.addf %44, %47 : vector<8x128xf32>
    %49 = vector.extract_strided_slice %48 {offsets = [0, 0], sizes = [8, 96], strides = [1, 1]} : vector<8x128xf32> to vector<8x96xf32>
    %50 = arith.negf %49 : vector<8x96xf32>
    %51 = math.exp %50 : vector<8x96xf32>
    %cst_26 = arith.constant 1.000000e+00 : f32
    %52 = vector.broadcast %cst_26 : f32 to vector<8x96xf32>
    %53 = arith.addf %52, %51 : vector<8x96xf32>
    %54 = arith.divf %52, %53 : vector<8x96xf32>
    %55 = vector.extract_strided_slice %48 {offsets = [0, 96], sizes = [8, 32], strides = [1, 1]} : vector<8x128xf32> to vector<8x32xf32>
    %56 = math.tanh %55 : vector<8x32xf32>
    %57 = vector.extract_strided_slice %54 {offsets = [0, 32], sizes = [8, 32], strides = [1, 1]} : vector<8x96xf32> to vector<8x32xf32>
    %58 = arith.mulf %57, %33 : vector<8x32xf32>
    %59 = vector.extract_strided_slice %54 {offsets = [0, 0], sizes = [8, 32], strides = [1, 1]} : vector<8x96xf32> to vector<8x32xf32>
    %60 = arith.mulf %59, %56 : vector<8x32xf32>
    %61 = arith.addf %58, %60 : vector<8x32xf32>
    %62 = vector.extract_strided_slice %54 {offsets = [0, 64], sizes = [8, 32], strides = [1, 1]} : vector<8x96xf32> to vector<8x32xf32>
    %63 = math.tanh %61 : vector<8x32xf32>
    %64 = arith.mulf %62, %63 : vector<8x32xf32>
    %65 = arith.index_cast %c1_i32 : i32 to index
    %c0_27 = arith.constant 0 : index
    %c0_28 = arith.constant 0 : index
    %66 = vector.load %arg7[%65, %c0_27, %c0_28] : memref<4x8x32xf32, #tpu.memory_space<vmem>>, vector<1x8x32xf32>
    %67 = vector.shape_cast %66 : vector<1x8x32xf32> to vector<8x32xf32>
    %68 = vector.shape_cast %64 : vector<8x32xf32> to vector<1x8x32xf32>
    tpu.vector_store %arg7[%65, %c0_27, %c0_28], %68 {strides = array<i32>} : memref<4x8x32xf32, #tpu.memory_space<vmem>>, vector<1x8x32xf32>,
    %c2_i32 = arith.constant 2 : i32
    %c8_i32_29 = arith.constant 8 : i32
    %69 = arith.muli %c2_i32, %c8_i32_29 : i32
    %70 = tpu.assume_multiple %69, 8 : i32
    %71 = arith.index_cast %70 : i32 to index
    %c0_30 = arith.constant 0 : index
    %72 = vector.load %arg12[%71, %c0_30] : memref<32x128xf32, #tpu.memory_space<vmem>>, vector<8x128xf32>
    %73 = arith.truncf %64 : vector<8x32xf32> to vector<8x32xbf16>
    %c0_31 = arith.constant 0 : index
    %c0_32 = arith.constant 0 : index
    %74 = vector.load %arg11[%c0_31, %c0_32] : memref<32x128xbf16, #tpu.memory_space<vmem>>, vector<32x128xbf16>
    %cst_33 = arith.constant dense<0.000000e+00> : vector<8x128xf32>
    %75 = tpu.matmul %73, %74, %cst_33 {dimension_numbers = #tpu.dot_dimension_numbers<[1], [0], [0], [1], [0, 0, 1, 1], [], []>} : vector<8x32xbf16>, vector<32x128xbf16>, vector<8x128xf32> -> vector<8x128xf32>
    %76 = arith.addf %72, %75 : vector<8x128xf32>
    %77 = vector.extract_strided_slice %76 {offsets = [0, 0], sizes = [8, 96], strides = [1, 1]} : vector<8x128xf32> to vector<8x96xf32>
    %78 = arith.negf %77 : vector<8x96xf32>
    %79 = math.exp %78 : vector<8x96xf32>
    %cst_34 = arith.constant 1.000000e+00 : f32
    %80 = vector.broadcast %cst_34 : f32 to vector<8x96xf32>
    %81 = arith.addf %80, %79 : vector<8x96xf32>
    %82 = arith.divf %80, %81 : vector<8x96xf32>
    %83 = vector.extract_strided_slice %76 {offsets = [0, 96], sizes = [8, 32], strides = [1, 1]} : vector<8x128xf32> to vector<8x32xf32>
    %84 = math.tanh %83 : vector<8x32xf32>
    %85 = vector.extract_strided_slice %82 {offsets = [0, 32], sizes = [8, 32], strides = [1, 1]} : vector<8x96xf32> to vector<8x32xf32>
    %86 = arith.mulf %85, %61 : vector<8x32xf32>
    %87 = vector.extract_strided_slice %82 {offsets = [0, 0], sizes = [8, 32], strides = [1, 1]} : vector<8x96xf32> to vector<8x32xf32>
    %88 = arith.mulf %87, %84 : vector<8x32xf32>
    %89 = arith.addf %86, %88 : vector<8x32xf32>
    %90 = vector.extract_strided_slice %82 {offsets = [0, 64], sizes = [8, 32], strides = [1, 1]} : vector<8x96xf32> to vector<8x32xf32>
    %91 = math.tanh %89 : vector<8x32xf32>
    %92 = arith.mulf %90, %91 : vector<8x32xf32>
    %93 = arith.index_cast %c2_i32 : i32 to index
    %c0_35 = arith.constant 0 : index
    %c0_36 = arith.constant 0 : index
    %94 = vector.load %arg7[%93, %c0_35, %c0_36] : memref<4x8x32xf32, #tpu.memory_space<vmem>>, vector<1x8x32xf32>
    %95 = vector.shape_cast %94 : vector<1x8x32xf32> to vector<8x32xf32>
    %96 = vector.shape_cast %92 : vector<8x32xf32> to vector<1x8x32xf32>
    tpu.vector_store %arg7[%93, %c0_35, %c0_36], %96 {strides = array<i32>} : memref<4x8x32xf32, #tpu.memory_space<vmem>>, vector<1x8x32xf32>,
    %c3_i32 = arith.constant 3 : i32
    %c8_i32_37 = arith.constant 8 : i32
    %97 = arith.muli %c3_i32, %c8_i32_37 : i32
    %98 = tpu.assume_multiple %97, 8 : i32
    %99 = arith.index_cast %98 : i32 to index
    %c0_38 = arith.constant 0 : index
    %100 = vector.load %arg12[%99, %c0_38] : memref<32x128xf32, #tpu.memory_space<vmem>>, vector<8x128xf32>
    %101 = arith.truncf %92 : vector<8x32xf32> to vector<8x32xbf16>
    %c0_39 = arith.constant 0 : index
    %c0_40 = arith.constant 0 : index
    %102 = vector.load %arg11[%c0_39, %c0_40] : memref<32x128xbf16, #tpu.memory_space<vmem>>, vector<32x128xbf16>
    %cst_41 = arith.constant dense<0.000000e+00> : vector<8x128xf32>
    %103 = tpu.matmul %101, %102, %cst_41 {dimension_numbers = #tpu.dot_dimension_numbers<[1], [0], [0], [1], [0, 0, 1, 1], [], []>} : vector<8x32xbf16>, vector<32x128xbf16>, vector<8x128xf32> -> vector<8x128xf32>
    %104 = arith.addf %100, %103 : vector<8x128xf32>
    %105 = vector.extract_strided_slice %104 {offsets = [0, 0], sizes = [8, 96], strides = [1, 1]} : vector<8x128xf32> to vector<8x96xf32>
    %106 = arith.negf %105 : vector<8x96xf32>
    %107 = math.exp %106 : vector<8x96xf32>
    %cst_42 = arith.constant 1.000000e+00 : f32
    %108 = vector.broadcast %cst_42 : f32 to vector<8x96xf32>
    %109 = arith.addf %108, %107 : vector<8x96xf32>
    %110 = arith.divf %108, %109 : vector<8x96xf32>
    %111 = vector.extract_strided_slice %104 {offsets = [0, 96], sizes = [8, 32], strides = [1, 1]} : vector<8x128xf32> to vector<8x32xf32>
    %112 = math.tanh %111 : vector<8x32xf32>
    %113 = vector.extract_strided_slice %110 {offsets = [0, 32], sizes = [8, 32], strides = [1, 1]} : vector<8x96xf32> to vector<8x32xf32>
    %114 = arith.mulf %113, %89 : vector<8x32xf32>
    %115 = vector.extract_strided_slice %110 {offsets = [0, 0], sizes = [8, 32], strides = [1, 1]} : vector<8x96xf32> to vector<8x32xf32>
    %116 = arith.mulf %115, %112 : vector<8x32xf32>
    %117 = arith.addf %114, %116 : vector<8x32xf32>
    %118 = vector.extract_strided_slice %110 {offsets = [0, 64], sizes = [8, 32], strides = [1, 1]} : vector<8x96xf32> to vector<8x32xf32>
    %119 = math.tanh %117 : vector<8x32xf32>
    %120 = arith.mulf %118, %119 : vector<8x32xf32>
    %121 = arith.index_cast %c3_i32 : i32 to index
    %c0_43 = arith.constant 0 : index
    %c0_44 = arith.constant 0 : index
    %122 = vector.load %arg7[%121, %c0_43, %c0_44] : memref<4x8x32xf32, #tpu.memory_space<vmem>>, vector<1x8x32xf32>
    %123 = vector.shape_cast %122 : vector<1x8x32xf32> to vector<8x32xf32>
    %124 = vector.shape_cast %120 : vector<8x32xf32> to vector<1x8x32xf32>
    tpu.vector_store %arg7[%121, %c0_43, %c0_44], %124 {strides = array<i32>} : memref<4x8x32xf32, #tpu.memory_space<vmem>>, vector<1x8x32xf32>,
    %c4_i32 = arith.constant 4 : i32
    %c0_45 = arith.constant 0 : index
    %c0_46 = arith.constant 0 : index
    %125 = vector.load %arg13[%c0_45, %c0_46] : memref<8x32xf32, #tpu.memory_space<vmem>>, vector<8x32xf32>
    tpu.vector_store %arg13[%c0_45, %c0_46], %120 {strides = array<i32>} : memref<8x32xf32, #tpu.memory_space<vmem>>, vector<8x32xf32>,
    %c0_47 = arith.constant 0 : index
    %c0_48 = arith.constant 0 : index
    %126 = vector.load %arg14[%c0_47, %c0_48] : memref<8x32xf32, #tpu.memory_space<vmem>>, vector<8x32xf32>
    tpu.vector_store %arg14[%c0_47, %c0_48], %117 {strides = array<i32>} : memref<8x32xf32, #tpu.memory_space<vmem>>, vector<8x32xf32>,
    %c1_i32_49 = arith.constant 1 : i32
    %127 = arith.cmpi eq, %arg1, %c1_i32_49 : i32
    %128 = arith.extui %127 : i1 to i32
    %c0_i32_50 = arith.constant 0 : i32
    %129 = arith.cmpi ne, %128, %c0_i32_50 : i32
    scf.if %129 {
      %c0_51 = arith.constant 0 : index
      %c0_52 = arith.constant 0 : index
      %130 = vector.load %arg8[%c0_51, %c0_52] : memref<8x32xf32, #tpu.memory_space<vmem>>, vector<8x32xf32>
      tpu.vector_store %arg8[%c0_51, %c0_52], %120 {strides = array<i32>} : memref<8x32xf32, #tpu.memory_space<vmem>>, vector<8x32xf32>,
      %c0_53 = arith.constant 0 : index
      %c0_54 = arith.constant 0 : index
      %131 = vector.load %arg9[%c0_53, %c0_54] : memref<8x32xf32, #tpu.memory_space<vmem>>, vector<8x32xf32>
      tpu.vector_store %arg9[%c0_53, %c0_54], %117 {strides = array<i32>} : memref<8x32xf32, #tpu.memory_space<vmem>>, vector<8x32xf32>,
    } else {
    }
    return
  }
  func.func @transform_0(%arg0: i32, %arg1: i32, %arg2: memref<2xi32, #tpu.memory_space<smem>>) -> (i32, i32, i32) {
    %c0_i32 = arith.constant 0 : i32
    %c0_i32_0 = arith.constant 0 : i32
    return %arg1, %arg0, %c0_i32 : i32, i32, i32
  }
  func.func @transform_3(%arg0: i32, %arg1: i32, %arg2: memref<2xi32, #tpu.memory_space<smem>>) -> (i32, i32) {
    %c0_i32 = arith.constant 0 : i32
    %c0_i32_0 = arith.constant 0 : i32
    %c0_i32_1 = arith.constant 0 : i32
    return %c0_i32, %c0_i32_0 : i32, i32
  }
  func.func @transform_4(%arg0: i32, %arg1: i32, %arg2: memref<2xi32, #tpu.memory_space<smem>>) -> (i32, i32, i32) {
    %c0_i32 = arith.constant 0 : i32
    %c0_i32_0 = arith.constant 0 : i32
    return %arg1, %arg0, %c0_i32 : i32, i32, i32
  }
  func.func @transform_5(%arg0: i32, %arg1: i32, %arg2: memref<2xi32, #tpu.memory_space<smem>>) -> (i32, i32) {
    %c0_i32 = arith.constant 0 : i32
    %c0_i32_0 = arith.constant 0 : i32
    return %arg0, %c0_i32 : i32, i32
  }
  func.func @transform_6(%arg0: i32, %arg1: i32, %arg2: memref<2xi32, #tpu.memory_space<smem>>) -> (i32, i32) {
    %c0_i32 = arith.constant 0 : i32
    %c0_i32_0 = arith.constant 0 : i32
    return %arg0, %c0_i32 : i32, i32
  }
}

</mosaic_0001>

<bundles_post_ra>
// kernel: tpu_custom_call.1
= control target key start
LH: loop header
LB: loop body
LE: loop exit
PB: predicated region body
PF: predicated region fallthrough
CT: control target
= control target key end

     0   :  { %s1810_s0 = inlined_call_operand.hbm [shape: s32[2], index: 0, kind: input, shape index: {}]   ;;  %s1811_s1 = inlined_call_operand.hbm [shape: bf16[8,8,32], index: 1, kind: input, shape index: {}]   ;;  %s1812_s2 = inlined_call_operand.hbm [shape: bf16[32,128], index: 2, kind: input, shape index: {}]   ;;  %s1813_s3 = inlined_call_operand.hbm [shape: bf16[32,128], index: 3, kind: input, shape index: {}]   ;;  %s1814_s4 = inlined_call_operand.vmem [shape: f32[1,128], index: 4, kind: input, shape index: {}]   ;;  %s1815_s5 = inlined_call_operand.hbm [shape: f32[8,8,32], index: 5, kind: output, shape index: {0}]   ;;  %s1816_s6 = inlined_call_operand.hbm [shape: f32[8,32], index: 6, kind: output, shape index: {1}]   ;;  %s1817_s7 = inlined_call_operand.hbm [shape: f32[8,32], index: 7, kind: output, shape index: {2}]  }
   0x1   :  { %1822 = sst [smem:[#allocation30_spill]] %s1811_s1  ;;  %s1171_s26 = scalar_lea.hbm %s1810_s0, 16 }
   0x2   :  { %p1172_p0 = scmp.ne.s32.totalorder %s1810_s0, %s1171_s26  ;;  %p1175_p1 = scmp.lt.u32.totalorder %s1171_s26, %s1810_s0 }
   0x4   :  { %p1177_p2 = pnand %p1175_p1, %p1172_p0 }
   0x6   :  { %1180 = shalt.err (!%p1177_p2)  }
   0x7   :  { %s1401_s8 = smov [#allocation9]  }
   0x8   :  { %14 = dma.hbm_to_smem %s1810_s0, 16, %s1401_s8, [#allocation8] }
   0x9   :  { %1359 = dma.done.wait [#allocation8], 16 }
   0xa   :  { %1360 = vsyncadd [#allocation8], 4294967280 }
   0xb   :  { %16 = sfence }
   0xc   :  { %17 = vsyncpa [#allocation11], 0 }
   0xd   :  { %19 = vsyncpa [#allocation11 + $0x1], 0 }
   0xe   :  { %20 = vsyncpa [#allocation12], 0 }
   0xf   :  { %22 = vsyncpa [#allocation12 + $0x1], 0 }
  0x10   :  { %23 = vsyncpa [#allocation15], 0  ;;  %s1470_s11 = smov 0   ;;  %s1472_s12 = smov 0  }
  0x11   :  { %s1474_s13 = smov 0   ;;  %s1476_s14 = smov 0  }
  0x12   :  { %s1478_s15 = smov 0   ;;  %s1480_s16 = smov 0  }
  0x13 LB: > { %s950_s0 = sadd.s32 4294967295, %s1399_s16   ;;  %s951_s17 = sadd.s32 4294967294, %s1399_s16   ;;  %s1399_s16 = sphi %s1480_s16, %s29_s16   ;;  %s1395_s15 = sphi %s1478_s15, %s1841_s15   ;;  %s1391_s14 = sphi %s1476_s14, %s1840_s14   ;;  %s1387_s13 = sphi %s1474_s13, %s1839_s13   ;;  %s1383_s12 = sphi %s1472_s12, %s1838_s12   ;;  %s1379_s11 = sphi %s1470_s11, %s1837_s11  }
  0x14   : > { %s38_s18 = sadd.s32 1, %s1395_s15  ;;  %s50_s19 = sadd.s32 1, %s1387_s13 }
  0x15   : > { %p39_p3 = scmp.ge.s32.totalorder %s38_s18, 2  ;;  %p57_p4 = scmp.ne.s32.totalorder %s1387_s13, %s1383_s12 }
  0x16   : > { %p58_p5 = scmp.eq.s32.totalorder %s1399_s16, 0  ;;  %p63_p6 = scmp.ne.s32.totalorder %s1383_s12, %s1379_s11 }
  0x17   : > { %s1843_s18 = smov (%p39_p3, %s38_s18), 0  ;;  %p64_p8 = scmp.eq.s32.totalorder %s950_s0, 0 }
  0x18   : > { %1823 = sst [smem:[#allocation29_spill]] %s1843_s18  ;;  %p1511_p7 = por %p58_p5, %p57_p4 }
  0x19   : > { %s45_s21 = ssub.s32 %s1395_s15, %s1843_s18  ;;  %p1517_p9 = scmp.eq.s32.totalorder %s950_s0, 1 }
  0x1a   : > { %p48_p10 = scmp.eq.s32.totalorder %s45_s21, 0  ;;  %p1521_p11 = por %p64_p8, %p63_p6 }
  0x1b   : > { %s1825_s22 = scalar_select %p1517_p9, 1, 0 }
  0x1c   : > { %p1527_p12 = por %p1517_p9, %p57_p4  ;;  %p116_p13 = scmp.eq.s32.totalorder %s951_s17, 1 }
  0x1d   : > { %s1532_s25 = scalar_select %p48_p10, %s1387_s13, %s50_s19  }
  0x1e   : > { %s1827_s24 = scalar_select %p1527_p12, 1, 0 }
  0x1f   : > { %p1534_p0 = por %p116_p13, %p63_p6  ;;  %p1068_p2 = scmp.lt.s32.totalorder %s1399_s16, 2 }
  0x20   : > { %s191_s27 = sand.u32 1, %s1387_s13   ;;  %s990_s29 = sshll.u32 %s1395_s15, 8 }
  0x21   : > { %s1828_s26 = scalar_select %p1534_p0, 1, 0 }
  0x22   : > { %s954_s28 = sshll.u32 %s191_s27, 4  ;;  %s1829_s1 = sld [smem:[#allocation30_spill]] }
  0x23   : > { %s195_s10 = scalar_lea.vmem [#allocation10], %s954_s28  ;;  %p1551_p3 = pnand %p1068_p2, %p1511_p7 }
  0x24   : > { %s203_s0 = sshll.u32 %s195_s10, 4  ;;  %s1556_s19 = scalar_lea.sflag [#allocation11], %s191_s27  ;;  %s1547_s0 = int_to_ptr.vmem [resolvable:$true] %s203_s0 }
  0x25   : > { %p1183_p6 = pneg %p1551_p3 }
  0x28   : > { %s1545_s9 = scalar_lea.hbm %s1829_s1, %s990_s29  ;;  %s1186_s20 = scalar_lea.hbm %s1829_s1, 512 }
  0x29   : > { %s1181_s21 = scalar_lea.hbm %s1545_s9, 256  ;;  %p1187_p7 = scmp.lt.u32.totalorder %s1545_s9, %s1829_s1 }
  0x2a   : > { %p1182_p5 = scmp.ne.s32.totalorder %s1545_s9, %s1181_s21  ;;  %p1188_p13 = scmp.lt.u32.totalorder %s1186_s20, %s1181_s21 }
  0x2b   : > { %p1190_p1 = scmp.lt.u32.totalorder %s1181_s21, %s1545_s9 }
  0x2c   : > { %p1184_p8 = pnand %p1183_p6, %p1182_p5  ;;  %p1189_p2 = por %p1188_p13, %p1187_p7 }
  0x2e   : > { %p1185_p10 = pneg %p1184_p8  ;;  %p1191_p4 = por %p1190_p1, %p1189_p2 }
  0x30   : > { %p1192_p0 = pnand %p1191_p4, %p1185_p10 }
  0x32   : > { %1195 = shalt.err (!%p1192_p0)
}
  0x33   : > { %s1196_s27 = scalar_lea.vmem %s1547_s0, 256  ;;  %s1402_s10 = smov [#allocation10]  }
  0x34   : > { %p1197_p5 = scmp.ne.s32.totalorder %s1547_s0, %s1196_s27  ;;  %s1201_s28 = sshll.u32 %s1402_s10, 4  ;;  %s1202_s28 = int_to_ptr.vmem [resolvable:$false] %s1201_s28 }
  0x35   : > { %s1203_s29 = scalar_lea.vmem %s1202_s28, 512  ;;  %p1204_p9 = scmp.lt.s32.totalorder %s1547_s0, %s1202_s28 }
  0x36   : > { %p1199_p8 = pnand %p1197_p5, %p1183_p6  ;;  %p1205_p7 = scmp.lt.s32.totalorder %s1203_s29, %s1196_s27 }
  0x38   : > { %p1200_p12 = pneg %p1199_p8  ;;  %p1206_p13 = por %p1205_p7, %p1204_p9 }
  0x3a   : > { %p1207_p1 = pnand %p1206_p13, %p1200_p12 }
  0x3c   : > { %1210 = shalt.err (!%p1207_p1)
}
  0x3d   : > { %s1403_s21 = smov 64   ;;  %s1404_s20 = smov 4  }
  0x3e   : > { %1063 = dma.hbm_to_vmem [thread:$0]  (!%p1551_p3), %s1545_s9, 256, %s1547_s0, %s1556_s19, %s1403_s21, %s1403_s21, %s1404_s20  }
  0x3f   : > { %p211_p0 = scmp.lt.s32.totalorder %s1399_s16, 3  ;;  %p1831_p4 = scmp.ge.s32.totalorder %s1399_s16, 1 }
  0x41   : > { %p212_p6 = pnand %p1831_p4, %p211_p0 }
  0x42   : > { %s1588_s30 = sand.u32 (!%p212_p6), 1, %s1383_s12  }
  0x43   : > { %215 = sbr.rel (%p212_p6) target bundleno = 3049 (0xbe9), region = 28  ;;  %s958_s8 = sshll.u32 (!%p212_p6), %s1588_s30, 4 }
  0x44   : > { %s218_s27 = scalar_lea.sflag (!%p212_p6), [#allocation11], %s1588_s30  ;;  %s1592_s10 = scalar_lea.vmem (!%p212_p6), [#allocation10], %s958_s8 }
  0x4a   : > { %1362 = dma.done.wait (%p1521_p11), %s218_s27, 256  }
  0x4b   : > { %1364 = vsyncadd (%p1521_p11), %s218_s27, 4294967040  ;;  %s959_s9 = sshll.u32 %s1588_s30, 5  ;;  %p960_p9 = scmp.ne.s32.totalorder %s1391_s14, 0 }
  0x4c   : > { %s1599_s0 = scalar_lea.vmem [#allocation13], %s959_s9  ;;  %vm276_vm0 = vcmask (!%p960_p9), 261120   ;;  %s1405_s17 = smov (!%p960_p9), [#allocation2]   ;;  %v1407_v0 = vmov (!%p960_p9), 0.0  }
  0x4d   : > { %252 = sbr.rel (%p960_p9) target bundleno = 146 (0x92), region = 36  ;;  %s260_s19 = sshll.u32 (!%p960_p9), %s1405_s17, 4  ;;  %277 = vst.msk [vmem:[#allocation5] sm:$0xff] (!%p960_p9), %vm276_vm0, %v1407_v0  ;;  %278 = vst.msk [vmem:[#allocation6] sm:$0xff] (!%p960_p9), %vm276_vm0, %v1407_v0  ;;  %s261_s19 = int_to_ptr.vmem [resolvable:$true] %s260_s19 }
  0x4e   : > { %s1406_s28 = smov (!%p960_p9), [#allocation3]   ;;  %s1211_s20 = scalar_lea.hbm (!%p960_p9), %s1812_s2, 256 }
  0x4f   : > { %s272_s29 = sshll.u32 (!%p960_p9), %s1406_s28, 4  ;;  %p1212_p11 = scmp.ne.s32.totalorder (!%p960_p9), %s1812_s2, %s1211_s20  ;;  %s273_s29 = int_to_ptr.vmem [resolvable:$true] %s272_s29 }
  0x50   : > { %p1215_p12 = scmp.lt.u32.totalorder (!%p960_p9), %s1211_s20, %s1812_s2 }
  0x52   : > { %p1217_p3 = pnand (!%p960_p9), %p1215_p12, %p1212_p11 }
  0x54   : > { %1220 = shalt.err (!%p1217_p3)  }
  0x55   : > { %s1221_s17 = scalar_lea.vmem %s261_s19, 256  ;;  %p1226_p2 = scmp.lt.s32.totalorder %s261_s19, %s261_s19 }
  0x56   : > { %p1222_p10 = scmp.ne.s32.totalorder %s261_s19, %s1221_s17  ;;  %p1227_p5 = scmp.lt.s32.totalorder %s1221_s17, %s1221_s17 }
  0x58   : > { %p1228_p8 = por %p1227_p5, %p1226_p2 }
  0x5a   : > { %p1229_p7 = pnand %p1228_p8, %p1222_p10 }
  0x5c   : > { %1232 = shalt.err (!%p1229_p7)  }
  0x5d   : > { %263 = dma.hbm_to_vmem [thread:$0]  %s1812_s2, 256, %s261_s19, [#allocation7] }
  0x5e   : > { %s1233_s27 = scalar_lea.hbm %s1813_s3, 256 }
  0x5f   : > { %p1234_p13 = scmp.ne.s32.totalorder %s1813_s3, %s1233_s27  ;;  %p1237_p1 = scmp.lt.u32.totalorder %s1233_s27, %s1813_s3 }
  0x61   : > { %p1239_p0 = pnand %p1237_p1, %p1234_p13 }
  0x63   : > { %1242 = shalt.err (!%p1239_p0)  }
  0x64   : > { %s1243_s17 = scalar_lea.vmem %s273_s29, 256  ;;  %p1248_p6 = scmp.lt.s32.totalorder %s273_s29, %s273_s29 }
  0x65   : > { %p1244_p4 = scmp.ne.s32.totalorder %s273_s29, %s1243_s17  ;;  %p1249_p9 = scmp.lt.s32.totalorder %s1243_s17, %s1243_s17 }
  0x67   : > { %p1250_p11 = por %p1249_p9, %p1248_p6 }
  0x69   : > { %p1251_p12 = pnand %p1250_p11, %p1244_p4 }
  0x6b   : > { %1254 = shalt.err (!%p1251_p12)  }
  0x6c   : > { %275 = dma.hbm_to_vmem [thread:$0]  %s1813_s3, 256, %s273_s29, [#allocation7 + $0x1] }
  0x6d   : > { %1365 = dma.done.wait [#allocation7], 256 }
  0x6e   : > { %1366 = vsyncadd [#allocation7], 4294967040 }
  0x6f   : > { %1367 = dma.done.wait [#allocation7 + $0x1], 256 }
  0x70   : > { %1368 = vsyncadd [#allocation7 + $0x1], 4294967040  ;;  %v286_v1 = vlaneseq  ;;  %s961_s18 = sld [smem:[#allocation9 + $0x1]]  ;;  %v344_v34 = vld [vmem:[#allocation3] sm:$0xff]  ;;  %v345_v37 = vld [vmem:[#allocation3 + $0x8] sm:$0xff] }
  0x71   : > { %v346_v40 = vunpack.c.l.bf16 %v344_v34  ;;  %v347_v41 = vunpack.c.h.bf16 %v344_v34  ;;  %v348_v46 = vunpack.c.l.bf16 %v345_v37  ;;  %v349_v47 = vunpack.c.h.bf16 %v345_v37 }
  0x72   : > { %v287_v2 = vshrl.u32 %v286_v1, 7  ;;  %v292_v3 = vand.u32 127, %v286_v1 }
  0x73   : > { %v350_v52 = vmul.f32 2.0, %v346_v40  ;;  %v351_v53 = vmul.f32 2.0, %v347_v41  ;;  %v352_v58 = vmul.f32 2.0, %v348_v46  ;;  %v353_v59 = vmul.f32 2.0, %v349_v47 }
  0x74   : > { %v288_v4 = vadd.s32 8, %v287_v2  ;;  %v289_v5 = vadd.s32 16, %v287_v2  ;;  %v290_v6 = vadd.s32 24, %v287_v2  ;;  %v293_v7 = vmul.u32 128, %v287_v2 }
  0x76   : > { %v294_v8 = vmul.u32 128, %v288_v4  ;;  %v295_v9 = vmul.u32 128, %v289_v5  ;;  %v297_v11 = vadd.s32 %v293_v7, %v292_v3  ;;  %s301_s21 = smul.u32 7919, %s961_s18 }
  0x77   : > { %v296_v10 = vmul.u32 128, %v290_v6 }
  0x78   : > { %v298_v12 = vadd.s32 %v294_v8, %v292_v3  ;;  %v299_v13 = vadd.s32 %v295_v9, %v292_v3  ;;  %s302_s29 = sadd.s32 104729, %s301_s21 }
  0x79   : > { %v300_v14 = vadd.s32 %v296_v10, %v292_v3  ;;  %v303_v15 = vstv %s302_s29 }
  0x7a   : > { %v304_v16 = vxor.u32 %v303_v15, %v297_v11  ;;  %v305_v17 = vxor.u32 %v303_v15, %v298_v12  ;;  %v306_v18 = vxor.u32 %v303_v15, %v299_v13 }
  0x7b   : > { %v307_v19 = vxor.u32 %v303_v15, %v300_v14 }
  0x7c   : > { %v308_v20 = vshrl.u32 %v304_v16, 16  ;;  %v309_v21 = vshrl.u32 %v305_v17, 16  ;;  %v310_v22 = vshrl.u32 %v306_v18, 16 }
  0x7d   : > { %v311_v23 = vshrl.u32 %v307_v19, 16 }
  0x7e   : > { %v312_v24 = vxor.u32 %v308_v20, %v304_v16  ;;  %v313_v25 = vxor.u32 %v309_v21, %v305_v17  ;;  %v314_v26 = vxor.u32 %v310_v22, %v306_v18 }
  0x7f   : > { %v315_v27 = vxor.u32 %v311_v23, %v307_v19 }
  0x80   : > { %v316_v28 = vmul.u32 2246822507, %v312_v24  ;;  %v317_v29 = vmul.u32 2246822507, %v313_v25 }
  0x81   : > { %v318_v30 = vmul.u32 2246822507, %v314_v26  ;;  %v319_v31 = vmul.u32 2246822507, %v315_v27 }
  0x82   : > { %v320_v32 = vshrl.u32 %v316_v28, 13  ;;  %v321_v33 = vshrl.u32 %v317_v29, 13 }
  0x83   : > { %v322_v35 = vshrl.u32 %v318_v30, 13  ;;  %v323_v36 = vshrl.u32 %v319_v31, 13 }
  0x84   : > { %v324_v38 = vxor.u32 %v320_v32, %v316_v28  ;;  %v325_v39 = vxor.u32 %v321_v33, %v317_v29 }
  0x85   : > { %v326_v42 = vxor.u32 %v322_v35, %v318_v30  ;;  %v327_v43 = vxor.u32 %v323_v36, %v319_v31 }
  0x86   : > { %v328_v44 = vmul.u32 3266489909, %v324_v38  ;;  %v329_v45 = vmul.u32 3266489909, %v325_v39 }
  0x87   : > { %v330_v48 = vmul.u32 3266489909, %v326_v42  ;;  %v331_v49 = vmul.u32 3266489909, %v327_v43 }
  0x88   : > { %v332_v50 = vshrl.u32 %v328_v44, 16  ;;  %v333_v51 = vshrl.u32 %v329_v45, 16 }
  0x89   : > { %v334_v54 = vshrl.u32 %v330_v48, 16  ;;  %v335_v55 = vshrl.u32 %v331_v49, 16 }
  0x8a   : > { %v336_v56 = vxor.u32 %v332_v50, %v328_v44  ;;  %v337_v57 = vxor.u32 %v333_v51, %v329_v45 }
  0x8b   : > { %v338_v60 = vxor.u32 %v334_v54, %v330_v48  ;;  %v339_v61 = vxor.u32 %v335_v55, %v331_v49 }
  0x8c   : > { %vm340_vm1 = vcmp.ge.u32.totalorder %v336_v56, 2147483648  ;;  %vm341_vm2 = vcmp.ge.u32.totalorder %v337_v57, 2147483648 }
  0x8d   : > { %v354_v62 = vsel %vm340_vm1, %v350_v52, 0.0  ;;  %v355_v63 = vsel %vm341_vm2, %v351_v53, 0.0  ;;  %vm342_vm3 = vcmp.ge.u32.totalorder %v338_v60, 2147483648  ;;  %vm343_vm4 = vcmp.ge.u32.totalorder %v339_v61, 2147483648 }
  0x8e   : > { %v358_v0 = vpack.c.bf16 %v355_v63, %v354_v62  ;;  %v356_v1 = vsel %vm342_vm3, %v352_v58, 0.0  ;;  %v357_v2 = vsel %vm343_vm4, %v353_v59, 0.0 }
  0x8f   : > { %v359_v3 = vpack.c.bf16 %v357_v2, %v356_v1 }
  0x90   : > { %360 = vst [vmem:[#allocation3] sm:$0xff] %v358_v0 }
  0x91   : > { %361 = vst [vmem:[#allocation3 + $0x8] sm:$0xff] %v359_v3 }
  0x92 PF: > { %v366_v4 = vld [vmem:[#allocation2] sm:$0xff]  ;;  %v367_v6 = vld [vmem:[#allocation2 + $0x8] sm:$0xff]  ;;  %v1408_v7 = vmov 0.0   ;;  %vm385_vm5 = vcmask 261120   ;;  %vm1409_vm6 = vmmov 0   ;;  %s1410_s8 = smov 32  }
  0x93   : > { %1008 = vmatprep.subr.bf16.mxu0 %v366_v4  ;;  %1016 = vmatprep.subr.bf16.mxu1 %v1408_v7  ;;  %v1137_v8 = vld [vmem:[%s1592_s10] sm:$0xff]   ;;  %v1138_v11 = vld [vmem:[%s1592_s10 + $0x8] sm:$0xff]   ;;  %s1411_s27 = smov 64   ;;  %s1412_s1 = smov 96  }
  0x94   : > { %1009 = vmatpush3.bf16.msra.mxu0 %v366_v4  ;;  %v445_v10 = vld [vmem:[#allocation5] sm:$0xff]  ;;  %1012 = vmatprep.mubr.msk.bf16.mxu0 %vm385_vm5, %v1137_v8  ;;  %v446_v28 = vld [vmem:[#allocation6] sm:$0xff]  ;;  %p978_p3 = scmp.ne.s32.totalorder %s1391_s14, 1 }
  0x95   : > { %1010 = vmatprep.subr.bf16.mxu0 %v367_v6  ;;  %1020 = vmatprep.mubr.msk.bf16.mxu1 %vm1409_vm6, %v1408_v7  ;;  %v448_v12 = vpack.c.bf16 %v445_v10, %v445_v10  ;;  %v962_v13 = vld [vmem:[%s1814_s4] ss:$0 sm:$0xff] }
  0x97   : > { %v1626_v5 = vld [vmem:[#allocation3] sm:$0xff] }
  0x98   : > { %1017 = vmatpush3.bf16.msra.mxu1 %v1626_v5  ;;  %v1632_v9 = vld [vmem:[#allocation3 + $0x8] sm:$0xff]  ;;  %1011 = vmatpush3.bf16.msra.mxu0 %v367_v6 }
  0x99   : > { %1018 = vmatprep.subr.bf16.mxu1 %v1408_v7  ;;  %1024 = vmatprep.subr.bf16.mxu0 %v1408_v7 }
  0x9b   : > { %1013 = vmatmul.mubr.msk.bf16.vlgmr.msra.gmra.mrb[0].mxu0 %vm385_vm5, %v1138_v11 }
  0x9c   : > { %1019 = vmatpush3.bf16.msra.mxu1 %v1632_v9  ;;  %1025 = vmatpush3.bf16.msra.mxu0 %v1626_v5 }
  0x9d   : > { %1032 = vmatprep.subr.bf16.mxu1 %v1408_v7  ;;  %1028 = vmatprep.mubr.msk.bf16.mxu0 %vm1409_vm6, %v1408_v7 }
  0x9e   : > { %1026 = vmatprep.subr.bf16.mxu0 %v1408_v7 }
  0x9f   : > { %1021 = vmatmul.mubr.msk.bf16.vlgmr.msra.gmra.mrb[0].mxu1 %vm385_vm5, %v448_v12 }
  0xa0   : > { %1033 = vmatpush3.bf16.msra.mxu1 %v1626_v5  ;;  %1036 = vmatprep.mubr.msk.bf16.mxu1 %vm1409_vm6, %v1408_v7 }
  0xa1   : > { %1034 = vmatprep.subr.bf16.mxu1 %v1408_v7  ;;  %1027 = vmatpush3.bf16.msra.mxu0 %v1632_v9 }
  0xa2   : > { %1040 = vmatprep.subr.bf16.mxu0 %v1408_v7 }
  0xa4   : > { %1035 = vmatpush3.bf16.msra.mxu1 %v1632_v9 }
 0x16e   : > { %v1014_v14 = vpop.f32.mrb[0].mxu0 }
 0x16f   : > { %v1657_v16 = vadd.f32 %v1014_v14, %v962_v13  ;;  %v426_v17 = vpop.f32.mrb[1].mxu0 }
 0x170   : > { %v427_v19 = vadd.f32 %v962_v13, %v426_v17  ;;  %v1015_v20 = vpop.f32.mrb[2].mxu0 }
 0x171   : > { %v1659_v22 = vadd.f32 %v1015_v20, %v962_v13  ;;  %v429_v23 = vpop.f32.mrb[3].mxu0 }
 0x172   : > { %v488_v15 = vpop.f32.mrb[0].mxu1  ;;  %v430_v26 = vadd.f32 %v962_v13, %v429_v23 }
 0x173   : > { %v1022_v18 = vpop.f32.mrb[1].mxu1  ;;  %v494_v25 = vadd.f32 %v488_v15, %v427_v19 }
 0x174   : > { %v491_v21 = vpop.f32.mrb[2].mxu1 }
 0x175   : > { %v1023_v24 = vpop.f32.mrb[3].mxu1  ;;  %1139 = vtanh.f32 %v494_v25  ;;  %v968_v29 = vmul.f32 -1.442695, %v494_v25 }
 0x177   : > { %1141 = vpow2.f32 %v968_v29 }
 0x17f   : > { %v1140_v27 = vpop.eup %1139 }
 0x180   : > { %508 = vrot.lane.b32.xlu0 %v1140_v27, %s1410_s8 }
 0x181   : > { %v1142_v30 = vpop.eup %1141 }
 0x182   : > { %v498_v31 = vadd.f32 1.0, %v1142_v30 }
 0x184   : > { %503 = vrot.lane.b32.xlu0 %v446_v28, %s1410_s8  ;;  %1143 = vrcp.f32 %v498_v31 }
 0x18e   : > { %v1144_v32 = vpop.eup %1143 }
 0x1f2   : > { %v509_v33 = vpop.permute.xlu0 %508 }
 0x1f3   : > { %v511_v34 = vmul.f32 %v1144_v32, %v509_v33 }
 0x1f5   : > { %513 = vrot.lane.b32.xlu1 %v511_v34, %s1410_s8 }
 0x1f6   : > { %v504_v35 = vpop.permute.xlu0 %503 }
 0x1f7   : > { %v506_v36 = vmul.f32 %v1144_v32, %v504_v35 }
 0x267   : > { %v514_v37 = vpop.permute.xlu1 %513 }
 0x268   : > { %v516_v38 = vadd.f32 %v514_v37, %v506_v36 }
 0x26a   : > { %1145 = vtanh.f32 %v516_v38 }
 0x274   : > { %v1146_v39 = vpop.eup %1145 }
 0x275   : > { %519 = vrot.lane.b32.xlu1 %v1146_v39, %s1410_s8 }
 0x2e7   : > { %v520_v40 = vpop.permute.xlu1 %519 }
 0x2e8   : > { %v1665_v41 = vmul.f32 %v1144_v32, %v520_v40 }
 0x2ea   : > { %v530_v42 = vpack.c.bf16 %v1665_v41, %v1665_v41 }
 0x2ec   : > { %534 = vrot.lane.b32.xlu0 %v530_v42, %s1411_s27 }
 0x35e   : > { %v535_v43 = vpop.permute.xlu0 %534 }
 0x35f   : > { %1029 = vmatmul.mubr.msk.bf16.vlgmr.msra.gmra.mrb[4].mxu0 %vm385_vm5, %v535_v43 }
 0x360   : > { %1041 = vmatpush3.bf16.msra.mxu0 %v1626_v5  ;;  %1044 = vmatprep.mubr.msk.bf16.mxu0 %vm1409_vm6, %v1408_v7 }
 0x361   : > { %1042 = vmatprep.subr.bf16.mxu0 %v1408_v7 }
 0x364   : > { %1043 = vmatpush3.bf16.msra.mxu0 %v1632_v9 }
 0x432   : > { %v573_v44 = vpop.f32.mrb[4].mxu0 }
 0x433   : > { %v579_v45 = vadd.f32 %v573_v44, %v430_v26  ;;  %v1030_v46 = vpop.f32.mrb[5].mxu0 }
 0x434   : > { %v576_v47 = vpop.f32.mrb[6].mxu0 }
 0x435   : > { %1147 = vtanh.f32 %v579_v45  ;;  %v1031_v48 = vpop.f32.mrb[7].mxu0  ;;  %v970_v50 = vmul.f32 -1.442695, %v579_v45 }
 0x437   : > { %1149 = vpow2.f32 %v970_v50 }
 0x43f   : > { %v1148_v49 = vpop.eup %1147 }
 0x440   : > { %589 = vrot.lane.b32.xlu1 %v1148_v49, %s1410_s8 }
 0x441   : > { %v1150_v51 = vpop.eup %1149 }
 0x442   : > { %v583_v52 = vadd.f32 1.0, %v1150_v51 }
 0x444   : > { %1151 = vrcp.f32 %v583_v52 }
 0x44e   : > { %v1152_v53 = vpop.eup %1151 }
 0x44f   : > { %v587_v56 = vmul.f32 %v1152_v53, %v516_v38 }
 0x4b2   : > { %v590_v54 = vpop.permute.xlu1 %589 }
 0x4b3   : > { %v592_v55 = vmul.f32 %v1152_v53, %v590_v54 }
 0x4b5   : > { %594 = vrot.lane.b32.xlu0 %v592_v55, %s1410_s8 }
 0x527   : > { %v595_v57 = vpop.permute.xlu0 %594 }
 0x528   : > { %v597_v58 = vadd.f32 %v595_v57, %v587_v56 }
 0x52a   : > { %1153 = vtanh.f32 %v597_v58 }
 0x534   : > { %v1154_v59 = vpop.eup %1153 }
 0x535   : > { %600 = vrot.lane.b32.xlu1 %v1154_v59, %s1410_s8 }
 0x5a7   : > { %v601_v60 = vpop.permute.xlu1 %600 }
 0x5a8   : > { %v1679_v61 = vmul.f32 %v1152_v53, %v601_v60 }
 0x5aa   : > { %v612_v62 = vpack.c.bf16 %v1679_v61, %v1679_v61 }
 0x5ac   : > { %616 = vrot.lane.b32.xlu0 %v612_v62, %s1411_s27 }
 0x61e   : > { %v617_v63 = vpop.permute.xlu0 %616 }
 0x61f   : > { %1037 = vmatmul.mubr.msk.bf16.vlgmr.msra.gmra.mrb[4].mxu1 %vm385_vm5, %v617_v63 }
 0x6f2   : > { %v655_v0 = vpop.f32.mrb[4].mxu1 }
 0x6f3   : > { %v661_v1 = vadd.f32 %v655_v0, %v1657_v16  ;;  %v1038_v2 = vpop.f32.mrb[5].mxu1 }
 0x6f4   : > { %v658_v3 = vpop.f32.mrb[6].mxu1 }
 0x6f5   : > { %1155 = vtanh.f32 %v661_v1  ;;  %v1039_v4 = vpop.f32.mrb[7].mxu1  ;;  %v973_v6 = vmul.f32 -1.442695, %v661_v1 }
 0x6f7   : > { %1157 = vpow2.f32 %v973_v6 }
 0x6ff   : > { %v1156_v5 = vpop.eup %1155 }
 0x700   : > { %671 = vrot.lane.b32.xlu1 %v1156_v5, %s1410_s8 }
 0x701   : > { %v1158_v7 = vpop.eup %1157 }
 0x702   : > { %v665_v8 = vadd.f32 1.0, %v1158_v7 }
 0x704   : > { %1159 = vrcp.f32 %v665_v8 }
 0x70e   : > { %v1160_v9 = vpop.eup %1159 }
 0x70f   : > { %v669_v12 = vmul.f32 %v1160_v9, %v597_v58 }
 0x772   : > { %v672_v10 = vpop.permute.xlu1 %671 }
 0x773   : > { %v674_v11 = vmul.f32 %v1160_v9, %v672_v10 }
 0x775   : > { %676 = vrot.lane.b32.xlu0 %v674_v11, %s1410_s8 }
 0x7e7   : > { %v677_v13 = vpop.permute.xlu0 %676 }
 0x7e8   : > { %v679_v14 = vadd.f32 %v677_v13, %v669_v12 }
 0x7ea   : > { %1161 = vtanh.f32 %v679_v14 }
 0x7f4   : > { %v1162_v15 = vpop.eup %1161 }
 0x7f5   : > { %682 = vrot.lane.b32.xlu1 %v1162_v15, %s1410_s8 }
 0x867   : > { %v683_v16 = vpop.permute.xlu1 %682 }
 0x868   : > { %v685_v17 = vmul.f32 %v1160_v9, %v683_v16 }
 0x86a   : > { %v694_v18 = vpack.c.bf16 %v685_v17, %v685_v17 }
 0x86c   : > { %698 = vrot.lane.b32.xlu0 %v694_v18, %s1411_s27 }
 0x8de   : > { %v699_v19 = vpop.permute.xlu0 %698 }
 0x8df   : > { %1045 = vmatmul.mubr.msk.bf16.vlgmr.msra.gmra.mrb[8].mxu0 %vm385_vm5, %v699_v19 }
 0x9b2   : > { %v737_v20 = vpop.f32.mrb[8].mxu0 }
 0x9b3   : > { %v743_v21 = vadd.f32 %v737_v20, %v1659_v22  ;;  %v1046_v23 = vpop.f32.mrb[9].mxu0 }
 0x9b4   : > { %v740_v24 = vpop.f32.mrb[10].mxu0 }
 0x9b5   : > { %1163 = vtanh.f32 %v743_v21  ;;  %v1047_v25 = vpop.f32.mrb[11].mxu0  ;;  %v976_v27 = vmul.f32 -1.442695, %v743_v21 }
 0x9b7   : > { %1165 = vpow2.f32 %v976_v27 }
 0x9bf   : > { %v1164_v26 = vpop.eup %1163 }
 0x9c0   : > { %753 = vrot.lane.b32.xlu1 %v1164_v26, %s1410_s8 }
 0x9c1   : > { %v1166_v28 = vpop.eup %1165 }
 0x9c2   : > { %v747_v29 = vadd.f32 1.0, %v1166_v28 }
 0x9c4   : > { %1167 = vrcp.f32 %v747_v29 }
 0x9ce   : > { %v1168_v30 = vpop.eup %1167 }
 0x9cf   : > { %v751_v22 = vmul.f32 %v1168_v30, %v679_v14 }
 0xa32   : > { %v754_v31 = vpop.permute.xlu1 %753 }
 0xa33   : > { %v756_v32 = vmul.f32 %v1168_v30, %v754_v31 }
 0xa35   : > { %758 = vrot.lane.b32.xlu0 %v756_v32, %s1410_s8 }
 0xa39   : > { %524 = vrot.lane.b32.xlu0 %v1665_v41, %s1411_s27 }
 0xa3d   : > { %687 = vrot.lane.b32.xlu0 %v685_v17, %s1411_s27 }
 0xaa7   : > { %v759_v33 = vpop.permute.xlu0 %758 }
 0xaa8   : > { %v761_v34 = vadd.f32 %v759_v33, %v751_v22 }
 0xaaa   : > { %1169 = vtanh.f32 %v761_v34  ;;  %776 = vrot.lane.b32.xlu0 %v761_v34, %s1412_s1 }
 0xaab   : > { %v525_v35 = vpop.permute.xlu0 %524 }
 0xaac   : > { %527 = vst.msk [vmem:[%s1599_s0] sm:$0xff] %vm385_vm5, %v525_v35 }
 0xaaf   : > { %v688_v36 = vpop.permute.xlu0 %687 }
 0xab0   : > { %974 = vst.msk [vmem:[%s1599_s0 + $0x10] sm:$0xff] %vm385_vm5, %v688_v36 }
 0xab4   : > { %v1170_v37 = vpop.eup %1169 }
 0xab5   : > { %764 = vrot.lane.b32.xlu1 %v1170_v37, %s1410_s8 }
 0xab9   : > { %605 = vrot.lane.b32.xlu1 %v1679_v61, %s1411_s27 }
 0xb1c   : > { %v777_v38 = vpop.permute.xlu0 %776 }
 0xb1d   : > { %779 = vst.msk [vmem:[#allocation6] sm:$0xff] %vm385_vm5, %v777_v38  ;;  %785 = vst.msk [vmem:[#allocation16] sm:$0xff] (!%p978_p3), %vm385_vm5, %v777_v38 }
 0xb27   : > { %v765_v39 = vpop.permute.xlu1 %764 }
 0xb28   : > { %v767_v40 = vmul.f32 %v1168_v30, %v765_v39 }
 0xb2a   : > { %769 = vrot.lane.b32.xlu1 %v767_v40, %s1411_s27 }
 0xb2b   : > { %v606_v41 = vpop.permute.xlu1 %605 }
 0xb2c   : > { %971 = vst.msk [vmem:[%s1599_s0 + $0x8] sm:$0xff] %vm385_vm5, %v606_v41 }
 0xb97   : > { %783 = sbr.rel (%p978_p3) target bundleno = 2975 (0xb9f), region = 48 }
 0xb9c   : > { %v770_v42 = vpop.permute.xlu1 %769 }
 0xb9d   : > { %977 = vst.msk [vmem:[%s1599_s0 + $0x18] sm:$0xff] %vm385_vm5, %v770_v42  ;;  %774 = vst.msk [vmem:[#allocation5] sm:$0xff] %vm385_vm5, %v770_v42 }
 0xb9e   : > { %784 = vst.msk [vmem:[#allocation14] sm:$0xff] %vm385_vm5, %v770_v42 }
 0xb9f PF: > { %s1413_s20 = smov [#allocation14]   ;;  %s991_s17 = sshll.u32 %s1391_s14, 9 }
 0xba0   : > { %s817_s9 = sshll.u32 %s1413_s20, 4  ;;  %p1832_p2 = scmp.ne.s32.totalorder %s1825_s22, 0  ;;  %s818_s9 = int_to_ptr.vmem [resolvable:$true] %s817_s9 }
 0xba1   : > { %s1255_s19 = scalar_lea.vmem %s818_s9, 128  ;;  %p1262_p7 = scmp.lt.s32.totalorder %s818_s9, %s818_s9 }
 0xba2   : > { %p1256_p10 = scmp.ne.s32.totalorder %s818_s9, %s1255_s19  ;;  %p1263_p13 = scmp.lt.s32.totalorder %s1255_s19, %s1255_s19 }
 0xba4   : > { %p1257_p5 = pnand %p1256_p10, %p1832_p2  ;;  %p1264_p1 = por %p1263_p13, %p1262_p7 }
 0xba6   : > { %p1258_p8 = pneg %p1257_p5 }
 0xba8   : > { %p1265_p0 = pnand %p1264_p1, %p1258_p8 }
 0xbaa   : > { %1268 = shalt.err (!%p1265_p0)
}
 0xbab   : > { %s1269_s21 = scalar_lea.hbm %s1816_s6, 128 }
 0xbac   : > { %p1270_p4 = scmp.ne.s32.totalorder %s1816_s6, %s1269_s21  ;;  %p1275_p11 = scmp.lt.u32.totalorder %s1269_s21, %s1816_s6 }
 0xbae   : > { %p1271_p6 = pnand %p1270_p4, %p1832_p2 }
 0xbb0   : > { %p1272_p9 = pneg %p1271_p6 }
 0xbb2   : > { %p1277_p12 = pnand %p1275_p11, %p1272_p9 }
 0xbb4   : > { %1280 = shalt.err (!%p1277_p12)
}
 0xbb5   : > { %1052 = dma.vmem_to_hbm [thread:$0]  (%p1832_p2), %s818_s9, 128, %s1816_s6, [#allocation15]  }
 0xbb6   : > { %s1736_s19 = scalar_lea.hbm %s1815_s5, %s991_s17  ;;  %s801_s28 = sshll.u32 %s1599_s0, 4  ;;  %s1739_s28 = int_to_ptr.vmem [resolvable:$true] %s801_s28 }
 0xbb7   : > { %s787_s18 = scalar_lea.sflag [#allocation12], %s1588_s30  ;;  %s1281_s21 = scalar_lea.vmem %s1739_s28, 512 }
 0xbb8   : > { %p1282_p3 = scmp.ne.s32.totalorder %s1739_s28, %s1281_s21  ;;  %p1833_p10 = scmp.ne.s32.totalorder %s1827_s24, 0 }
 0xbb9   : > { %s1414_s29 = smov [#allocation13]  }
 0xbba   : > { %p1283_p5 = pnand %p1282_p3, %p1833_p10  ;;  %s1285_s10 = sshll.u32 %s1414_s29, 4  ;;  %s1286_s10 = int_to_ptr.vmem [resolvable:$false] %s1285_s10 }
 0xbbb   : > { %s1287_s9 = scalar_lea.vmem %s1286_s10, 1024  ;;  %p1288_p7 = scmp.lt.s32.totalorder %s1739_s28, %s1286_s10 }
 0xbbc   : > { %p1284_p8 = pneg %p1283_p5  ;;  %p1289_p13 = scmp.lt.s32.totalorder %s1287_s9, %s1281_s21 }
 0xbbe   : > { %p1290_p1 = por %p1289_p13, %p1288_p7 }
 0xbc0   : > { %p1291_p0 = pnand %p1290_p1, %p1284_p8 }
 0xbc2   : > { %1294 = shalt.err (!%p1291_p0)
}
 0xbc3   : > { %s1295_s0 = scalar_lea.hbm %s1736_s19, 512  ;;  %s1299_s23 = scalar_lea.hbm %s1815_s5, 1024 }
 0xbc4   : > { %p1296_p4 = scmp.ne.s32.totalorder %s1736_s19, %s1295_s0  ;;  %p1300_p11 = scmp.lt.u32.totalorder %s1736_s19, %s1815_s5 }
 0xbc5   : > { %p1301_p12 = scmp.lt.u32.totalorder %s1299_s23, %s1295_s0  ;;  %p1303_p5 = scmp.lt.u32.totalorder %s1295_s0, %s1736_s19 }
 0xbc6   : > { %p1297_p6 = pnand %p1296_p4, %p1833_p10 }
 0xbc7   : > { %p1302_p3 = por %p1301_p12, %p1300_p11 }
 0xbc8   : > { %p1298_p9 = pneg %p1297_p6 }
 0xbc9   : > { %p1304_p8 = por %p1303_p5, %p1302_p3 }
 0xbcb   : > { %p1305_p7 = pnand %p1304_p8, %p1298_p9 }
 0xbcd   : > { %1308 = shalt.err (!%p1305_p7)
}
 0xbce   : > { %s1415_s1 = smov 128   ;;  %s1416_s20 = smov 8  }
 0xbcf   : > { %1050 = dma.vmem_to_hbm [thread:$0]  (%p1833_p10), %s1739_s28, 512, %s1736_s19, %s787_s18, %s1415_s1, %s1415_s1, %s1416_s20  }
 0xbd0   : > { %s1417_s21 = smov [#allocation16]  }
 0xbd1   : > { %s830_s29 = sshll.u32 %s1417_s21, 4  ;;  %s831_s29 = int_to_ptr.vmem [resolvable:$true] %s830_s29 }
 0xbd2   : > { %s1309_s10 = scalar_lea.vmem %s831_s29, 128  ;;  %p1316_p4 = scmp.lt.s32.totalorder %s831_s29, %s831_s29 }
 0xbd3   : > { %p1310_p13 = scmp.ne.s32.totalorder %s831_s29, %s1309_s10  ;;  %p1317_p6 = scmp.lt.s32.totalorder %s1309_s10, %s1309_s10 }
 0xbd5   : > { %p1311_p1 = pnand %p1310_p13, %p1832_p2  ;;  %p1318_p9 = por %p1317_p6, %p1316_p4 }
 0xbd7   : > { %p1312_p0 = pneg %p1311_p1 }
 0xbd9   : > { %p1319_p11 = pnand %p1318_p9, %p1312_p0 }
 0xbdb   : > { %1322 = shalt.err (!%p1319_p11)
}
 0xbdc   : > { %s1323_s24 = scalar_lea.hbm %s1817_s7, 128 }
 0xbdd   : > { %p1324_p10 = scmp.ne.s32.totalorder %s1817_s7, %s1323_s24  ;;  %p1329_p5 = scmp.lt.u32.totalorder %s1323_s24, %s1817_s7 }
 0xbdf   : > { %p1325_p12 = pnand %p1324_p10, %p1832_p2 }
 0xbe1   : > { %p1326_p3 = pneg %p1325_p12 }
 0xbe3   : > { %p1331_p8 = pnand %p1329_p5, %p1326_p3 }
 0xbe5   : > { %1334 = shalt.err (!%p1331_p8)
}
 0xbe6   : > { %1054 = dma.vmem_to_hbm [thread:$0]  (%p1832_p2), %s831_s29, 128, %s1817_s7, [#allocation15]  }
 0xbe7   : > { %1370 = dma.done.wait (%p1832_p2), [#allocation15], 256  }
 0xbe8   : > { %1372 = vsyncadd (%p1832_p2), [#allocation15], 4294967040 }
 0xbe9 PF: > { %s850_s23 = sand.u32 1, %s1379_s11   ;;  %p1834_p7 = scmp.ne.s32.totalorder %s1828_s26, 0 }
 0xbea   : > { %p1835_p13 = scmp.ge.s32.totalorder %s1399_s16, 2  ;;  %s851_s8 = scalar_lea.sflag [#allocation12], %s850_s23 }
 0xbec   : > { %p1065_p1 = pnand %p1835_p13, %p1834_p7 }
 0xbee   : > { %1374 = dma.done.wait (!%p1065_p1), %s851_s8, 512  }
 0xbef   : > { %1376 = vsyncadd (!%p1065_p1), %s851_s8, 4294966784  ;;  %s29_s16 = sadd.s32 1, %s1399_s16   ;;  %s1836_s22 = sld [smem:[#allocation29_spill]] }
 0xbf0   : > { %p26_p0 = scmp.ge.s32.totalorder %s29_s16, 4   ;;  %s1837_s11 = smov %s1383_s12 }
 0xbf1   : > { %s1838_s12 = smov %s1387_s13  ;;  %s1839_s13 = smov %s1532_s25 }
 0xbf2   : > { %s1840_s14 = smov %s1395_s15  ;;  %28 = sbr.rel (!%p26_p0) target bundleno = 19 (0x13), region = 115 }
 0xbf5   : > { %s1841_s15 = smov %s1836_s22 }
 0xbf9   :  { %856 = vsyncpa [#allocation11], 1 }
 0xbfa   :  { %858 = vsyncpa [#allocation11 + $0x1], 1 }
 0xbfb   :  { %859 = vsyncpa [#allocation12], 1 }
 0xbfc   :  { %861 = vsyncpa [#allocation12 + $0x1], 1 }
 0xbfd   :  { %862 = vsyncpa [#allocation15], 1 }
 0xbfe   :  { %863 = vsyncmov [#allocation7] }
 0xc01   :  { %s864_s26 = vpop.sfrf %863 }
 0xc02   :  { %p988_p2 = scmp.ne.s32.totalorder %s864_s26, 0 }
 0xc04   :  { %868 = shalt.err (%p988_p2)  }
 0xc05   :  { %870 = vsyncmov [#allocation7 + $0x1] }
 0xc08   :  { %s871_s27 = vpop.sfrf %870 }
 0xc09   :  { %p989_p4 = scmp.ne.s32.totalorder %s871_s27, 0 }
 0xc0b   :  { %875 = shalt.err (%p989_p4)  }

</bundles_post_ra>
